<compile_context>
chip_gen: v7x
topology: tpu7x:2x2x1
jax: 0.10.0
libtpu: 0.0.40
codegen_flags: <defaults>
</compile_context>

<pallas_src>
import jax
import jax.numpy as jnp
from jax.experimental import pallas as pl
from jax.experimental.pallas import tpu as pltpu


# ----------------------------- Pallas kernel ------------------------------- #

def fused_mri2dslice_kernel(x_ref, t0_ref, t1_ref, t2_ref, bias_ref,
                            rsel_ref, csel_ref, wpost_ref, bpost_ref,
                            wreg_ref, breg_ref, o_ref, acc_ref):
    """Fully fused forward pass.

    x_ref   : (NS*Hp, Wp)  zero-padded, slice-major row stack of all slices
    t*_ref  : (Wp, W*E)    Toeplitz conv weights for row shift di = 0, 1, 2
    bias_ref: (1, W*E)     conv bias tiled over output columns
    rsel_ref: (B, R)       valid-row selector per batch elem (carries 1/(S*H))
    csel_ref: (W*E, E)     channel-fold selector (carries 1/W)
    wpost_ref: (E, 64), bpost_ref: (1, 64)   -- attn_post
    wreg_ref : (1, 64), breg_ref: (1, 1)     -- regressor[1]
    o_ref   : (B, 1)
    acc_ref : (R, W*E) f32 VMEM scratch (lane-dense feature slab)
    """
    R = acc_ref.shape[0]

    # 3x3 conv as 3 accumulated Toeplitz matmuls (row shift via ref slicing).
    acc_ref[...] = jnp.dot(x_ref[0:R, :], t0_ref[...],
                           preferred_element_type=jnp.float32)
    acc_ref[...] += jnp.dot(x_ref[1:R + 1, :], t1_ref[...],
                            preferred_element_type=jnp.float32)
    acc_ref[...] += jnp.dot(x_ref[2:R + 2, :], t2_ref[...],
                            preferred_element_type=jnp.float32)

    # bias + ReLU, kept lane-dense in the (R, W*E) scratch.
    acc_ref[...] = jnp.maximum(acc_ref[...] + bias_ref[...], 0.0)

    # Global-avg-pool per slice + MeanPool over slices: row-selector matmul
    # (picks valid rows of each batch elem) then channel fold over the W axis.
    pooled = jnp.dot(rsel_ref[...], acc_ref[...],
                     preferred_element_type=jnp.float32)          # (B, W*E)
    emb = jnp.dot(pooled, csel_ref[...],
                  preferred_element_type=jnp.float32)             # (B, E)

    # attn_post Linear -> ReLU -> regressor Linear (lane reduction, N=1).
    post = jnp.dot(emb, wpost_ref[...],
                   preferred_element_type=jnp.float32) + bpost_ref[...]
    h = jnp.maximum(post, 0.0)
    o_ref[...] = jnp.sum(h * wreg_ref[...], axis=1, keepdims=True) + breg_ref[...]


# ------------------------------- Wrapper ----------------------------------- #

def _build_toeplitz(wc, W):
    """Conv2d(1->E, 3x3) weight -> three (Wp, W*E) Toeplitz matrices (one per row shift)."""
    E = wc.shape[0]
    Wp = W + 2
    jj = jnp.arange(Wp)[:, None]                 # padded input column
    j = jnp.arange(W)[None, :]                   # output column
    dj = jj - j
    mask = (dj >= 0) & (dj <= 2)
    djc = jnp.clip(dj, 0, 2)
    ts = []
    for di in range(3):
        w_tap = wc[:, 0, di, :].T                # (3, E)
        t3 = jnp.where(mask[:, :, None], w_tap[djc], 0.0)   # (Wp, W, E)
        ts.append(t3.reshape(Wp, W * E))
    return ts


def mri2dslice_forward(x, params):
    """x: (B, 1, S, H, W) float32.  Returns dict(y_pred=(B,1), attention=None)."""
    B, C, S, H, W = x.shape
    assert C == 1
    E = params["wc"].shape[0]
    NS = S * B
    Hp, Wp = H + 2, W + 2
    R = NS * Hp - 2
    WE = W * E

    # --- slice collation (slice_dim=1, in_channel=1): slice-major (n = s*B + b),
    #     plus the conv's zero padding (only ~1.27x, no 9x im2col array).
    imgs = jnp.transpose(x[:, 0], (1, 0, 2, 3)).reshape(NS, H, W)
    x2 = jnp.pad(imgs, ((0, 0), (1, 1), (1, 1))).reshape(NS * Hp, Wp)

    # --- weight / selector preprocessing (depends only on params & static shapes).
    t0, t1, t2 = _build_toeplitz(params["wc"], W)
    bias_row = jnp.tile(params["bc"], W).reshape(1, WE)

    r = jnp.arange(R)
    valid = (r % Hp) < H                          # drop pad-border output rows
    bidx = (r // Hp) % B                          # batch element of each row
    rsel = (valid[None, :] & (bidx[None, :] == jnp.arange(B)[:, None]))
    rsel = rsel.astype(jnp.float32) / (S * H)     # slice mean + row part of GAP

    c = jnp.arange(WE)
    csel = (c[:, None] % E == jnp.arange(E)[None, :]).astype(jnp.float32) / W

    vmem = pl.BlockSpec(memory_space=pltpu.MemorySpace.VMEM)
    y_pred = pl.pallas_call(
        fused_mri2dslice_kernel,
        out_shape=jax.ShapeDtypeStruct((B, 1), jnp.float32),
        in_specs=[vmem] * 11,
        out_specs=vmem,
        scratch_shapes=[pltpu.VMEM((R, WE), jnp.float32)],
    )(
        x2, t0, t1, t2, bias_row, rsel, csel,
        params["w_post"].T,                   # (E, 64)
        params["b_post"].reshape(1, -1),      # (1, 64)
        params["w_reg"].reshape(1, -1),       # (1, 64)
        params["b_reg"].reshape(1, 1),        # (1, 1)
    )

    # TODO(synk): MeanPool's attention payload is not defined in the source; returning None.
    return {"y_pred": y_pred, "attention": None}


# ----------------------- deterministic parameter init ---------------------- #

def init_params(key, E):
    k1, k2, k3 = jax.random.split(key, 3)
    # Conv2d(in=1, out=E, 3x3): kaiming_normal_ fan_out, relu gain; bias=0
    wc = jax.random.normal(k1, (E, 1, 3, 3), jnp.float32) * jnp.sqrt(2.0 / (E * 9))
    bc = jnp.zeros((E,), jnp.float32)
    # attn_post Linear(E, 64): normal(0, 0.01), bias 0
    w_post = jax.random.normal(k2, (64, E), jnp.float32) * 0.01
    b_post = jnp.zeros((64,), jnp.float32)
    # regressor Linear(64, 1): default-style uniform weight, bias filled with 62.68
    bound = 1.0 / jnp.sqrt(64.0)
    w_reg = jax.random.uniform(k3, (1, 64), jnp.float32, minval=-bound, maxval=bound)
    b_reg = jnp.full((1,), 62.68, jnp.float32)
    return dict(wc=wc, bc=bc, w_post=w_post, b_post=b_post, w_reg=w_reg, b_reg=b_reg)


# ----------------------------- pure-JAX reference --------------------------- #

def im2col_3x3(img):
    """(H, W) image -> (H*W, 9) 3x3 patches with zero padding (stride 1)."""
    H, W = img.shape
    p = jnp.pad(img, 1)
    cols = [p[i:i + H, j:j + W] for i in range(3) for j in range(3)]
    return jnp.stack(cols, axis=-1).reshape(H * W, 9)


def reference_forward(x, params):
    B, C, S, H, W = x.shape
    E = params["wc"].shape[0]
    imgs = jnp.transpose(x[:, 0], (1, 0, 2, 3)).reshape(S * B, H, W)
    patches = jax.vmap(im2col_3x3)(imgs)                                  # (NS, HW, 9)
    wc = params["wc"].reshape(E, 9).T
    h = jnp.einsum("npk,ke->npe", patches, wc,
                   precision=jax.lax.Precision.HIGHEST) + params["bc"]
    enc = jnp.mean(jnp.maximum(h, 0.0), axis=1)                           # (NS, E)
    enc = enc.reshape(S, B, E).transpose(1, 0, 2)                         # (B, S, E)
    pooled = jnp.mean(enc, axis=1)                                        # (B, E)
    post = pooled @ params["w_post"].T + params["b_post"]
    return jnp.maximum(post, 0.0) @ params["w_reg"].T + params["b_reg"]


# ----------------------------------- main ----------------------------------- #

if __name__ == "__main__":
    # Small, module-consistent shapes: B=2, C=1 (in_channel), S=8 slices, 16x16 slice,
    # attn_num_heads=2, attn_dim=16 -> embedding E = 32.
    B, S, H, W = 2, 8, 16, 16
    num_heads, attn_dim = 2, 16
    E = num_heads * attn_dim

    key = jax.random.PRNGKey(0)
    kx, kp = jax.random.split(key)
    x = jax.random.normal(kx, (B, 1, S, H, W), jnp.float32)
    params = init_params(kp, E)

    out = mri2dslice_forward(x, params)
    y = jax.block_until_ready(out["y_pred"])

    y_ref = reference_forward(x, params)
    assert y.shape == (B, 1)
    assert jnp.allclose(y, y_ref, atol=1e-2), (y, y_ref)

    print("KERNEL_OK")
</pallas_src>

<mosaic_0001>
module attributes {stable_mosaic.version = 11 : i64} {
  func.func @fused_mri2dslice_kernel(%arg0: memref<288x18xf32, #tpu.memory_space<vmem>>, %arg1: memref<18x512xf32, #tpu.memory_space<vmem>>, %arg2: memref<18x512xf32, #tpu.memory_space<vmem>>, %arg3: memref<18x512xf32, #tpu.memory_space<vmem>>, %arg4: memref<1x512xf32, #tpu.memory_space<vmem>>, %arg5: memref<2x286xf32, #tpu.memory_space<vmem>>, %arg6: memref<512x32xf32, #tpu.memory_space<vmem>>, %arg7: memref<32x64xf32, #tpu.memory_space<vmem>>, %arg8: memref<1x64xf32, #tpu.memory_space<vmem>>, %arg9: memref<1x64xf32, #tpu.memory_space<vmem>>, %arg10: memref<1x1xf32, #tpu.memory_space<vmem>>, %arg11: memref<2x1xf32, #tpu.memory_space<vmem>>, %arg12: memref<286x512xf32, #tpu.memory_space<vmem>>) attributes {dimension_semantics = [], scalar_prefetch = 0 : i64, scratch_operands = 1 : i64, tpu.core_type = #tpu.core_type<tc>} {
    %c0 = arith.constant 0 : index
    %c0_0 = arith.constant 0 : index
    %0 = vector.load %arg0[%c0, %c0_0] : memref<288x18xf32, #tpu.memory_space<vmem>>, vector<286x18xf32>
    %c0_1 = arith.constant 0 : index
    %c0_2 = arith.constant 0 : index
    %1 = vector.load %arg1[%c0_1, %c0_2] : memref<18x512xf32, #tpu.memory_space<vmem>>, vector<18x512xf32>
    %cst = arith.constant dense<0.000000e+00> : vector<286x512xf32>
    %2 = tpu.matmul %0, %1, %cst {dimension_numbers = #tpu.dot_dimension_numbers<[1], [0], [0], [1], [0, 0, 1, 1], [], []>} : vector<286x18xf32>, vector<18x512xf32>, vector<286x512xf32> -> vector<286x512xf32>
    %c0_3 = arith.constant 0 : index
    %c0_4 = arith.constant 0 : index
    %3 = vector.load %arg12[%c0_3, %c0_4] : memref<286x512xf32, #tpu.memory_space<vmem>>, vector<286x512xf32>
    tpu.vector_store %arg12[%c0_3, %c0_4], %2 {strides = array<i32>} : memref<286x512xf32, #tpu.memory_space<vmem>>, vector<286x512xf32>,
    %c0_5 = arith.constant 0 : index
    %c0_6 = arith.constant 0 : index
    %4 = vector.load %arg12[%c0_5, %c0_6] : memref<286x512xf32, #tpu.memory_space<vmem>>, vector<286x512xf32>
    %c1 = arith.constant 1 : index
    %c0_7 = arith.constant 0 : index
    %5 = vector.load %arg0[%c1, %c0_7] : memref<288x18xf32, #tpu.memory_space<vmem>>, vector<286x18xf32>
    %c0_8 = arith.constant 0 : index
    %c0_9 = arith.constant 0 : index
    %6 = vector.load %arg2[%c0_8, %c0_9] : memref<18x512xf32, #tpu.memory_space<vmem>>, vector<18x512xf32>
    %cst_10 = arith.constant dense<0.000000e+00> : vector<286x512xf32>
    %7 = tpu.matmul %5, %6, %cst_10 {dimension_numbers = #tpu.dot_dimension_numbers<[1], [0], [0], [1], [0, 0, 1, 1], [], []>} : vector<286x18xf32>, vector<18x512xf32>, vector<286x512xf32> -> vector<286x512xf32>
    %8 = arith.addf %4, %7 : vector<286x512xf32>
    %c0_11 = arith.constant 0 : index
    %c0_12 = arith.constant 0 : index
    %9 = vector.load %arg12[%c0_11, %c0_12] : memref<286x512xf32, #tpu.memory_space<vmem>>, vector<286x512xf32>
    tpu.vector_store %arg12[%c0_11, %c0_12], %8 {strides = array<i32>} : memref<286x512xf32, #tpu.memory_space<vmem>>, vector<286x512xf32>,
    %c0_13 = arith.constant 0 : index
    %c0_14 = arith.constant 0 : index
    %10 = vector.load %arg12[%c0_13, %c0_14] : memref<286x512xf32, #tpu.memory_space<vmem>>, vector<286x512xf32>
    %c2 = arith.constant 2 : index
    %c0_15 = arith.constant 0 : index
    %11 = vector.load %arg0[%c2, %c0_15] : memref<288x18xf32, #tpu.memory_space<vmem>>, vector<286x18xf32>
    %c0_16 = arith.constant 0 : index
    %c0_17 = arith.constant 0 : index
    %12 = vector.load %arg3[%c0_16, %c0_17] : memref<18x512xf32, #tpu.memory_space<vmem>>, vector<18x512xf32>
    %cst_18 = arith.constant dense<0.000000e+00> : vector<286x512xf32>
    %13 = tpu.matmul %11, %12, %cst_18 {dimension_numbers = #tpu.dot_dimension_numbers<[1], [0], [0], [1], [0, 0, 1, 1], [], []>} : vector<286x18xf32>, vector<18x512xf32>, vector<286x512xf32> -> vector<286x512xf32>
    %14 = arith.addf %10, %13 : vector<286x512xf32>
    %c0_19 = arith.constant 0 : index
    %c0_20 = arith.constant 0 : index
    %15 = vector.load %arg12[%c0_19, %c0_20] : memref<286x512xf32, #tpu.memory_space<vmem>>, vector<286x512xf32>
    tpu.vector_store %arg12[%c0_19, %c0_20], %14 {strides = array<i32>} : memref<286x512xf32, #tpu.memory_space<vmem>>, vector<286x512xf32>,
    %c0_21 = arith.constant 0 : index
    %c0_22 = arith.constant 0 : index
    %16 = vector.load %arg12[%c0_21, %c0_22] : memref<286x512xf32, #tpu.memory_space<vmem>>, vector<286x512xf32>
    %c0_23 = arith.constant 0 : index
    %c0_24 = arith.constant 0 : index
    %17 = vector.load %arg4[%c0_23, %c0_24] : memref<1x512xf32, #tpu.memory_space<vmem>>, vector<1x512xf32>
    %18 = vector.broadcast %17 : vector<1x512xf32> to vector<286x512xf32>
    %19 = arith.addf %16, %18 : vector<286x512xf32>
    %cst_25 = arith.constant 0.000000e+00 : f32
    %20 = vector.broadcast %cst_25 : f32 to vector<286x512xf32>
    %21 = arith.maximumf %19, %20 : vector<286x512xf32>
    %c0_26 = arith.constant 0 : index
    %c0_27 = arith.constant 0 : index
    %22 = vector.load %arg12[%c0_26, %c0_27] : memref<286x512xf32, #tpu.memory_space<vmem>>, vector<286x512xf32>
    tpu.vector_store %arg12[%c0_26, %c0_27], %21 {strides = array<i32>} : memref<286x512xf32, #tpu.memory_space<vmem>>, vector<286x512xf32>,
    %c0_28 = arith.constant 0 : index
    %c0_29 = arith.constant 0 : index
    %23 = vector.load %arg5[%c0_28, %c0_29] : memref<2x286xf32, #tpu.memory_space<vmem>>, vector<2x286xf32>
    %c0_30 = arith.constant 0 : index
    %c0_31 = arith.constant 0 : index
    %24 = vector.load %arg12[%c0_30, %c0_31] : memref<286x512xf32, #tpu.memory_space<vmem>>, vector<286x512xf32>
    %cst_32 = arith.constant dense<0.000000e+00> : vector<2x512xf32>
    %25 = tpu.matmul %23, %24, %cst_32 {dimension_numbers = #tpu.dot_dimension_numbers<[1], [0], [0], [1], [0, 0, 1, 1], [], []>} : vector<2x286xf32>, vector<286x512xf32>, vector<2x512xf32> -> vector<2x512xf32>
    %c0_33 = arith.constant 0 : index
    %c0_34 = arith.constant 0 : index
    %26 = vector.load %arg6[%c0_33, %c0_34] : memref<512x32xf32, #tpu.memory_space<vmem>>, vector<512x32xf32>
    %cst_35 = arith.constant dense<0.000000e+00> : vector<2x32xf32>
    %27 = tpu.matmul %25, %26, %cst_35 {dimension_numbers = #tpu.dot_dimension_numbers<[1], [0], [0], [1], [0, 0, 1, 1], [], []>} : vector<2x512xf32>, vector<512x32xf32>, vector<2x32xf32> -> vector<2x32xf32>
    %c0_36 = arith.constant 0 : index
    %c0_37 = arith.constant 0 : index
    %28 = vector.load %arg7[%c0_36, %c0_37] : memref<32x64xf32, #tpu.memory_space<vmem>>, vector<32x64xf32>
    %cst_38 = arith.constant dense<0.000000e+00> : vector<2x64xf32>
    %29 = tpu.matmul %27, %28, %cst_38 {dimension_numbers = #tpu.dot_dimension_numbers<[1], [0], [0], [1], [0, 0, 1, 1], [], []>} : vector<2x32xf32>, vector<32x64xf32>, vector<2x64xf32> -> vector<2x64xf32>
    %c0_39 = arith.constant 0 : index
    %c0_40 = arith.constant 0 : index
    %30 = vector.load %arg8[%c0_39, %c0_40] : memref<1x64xf32, #tpu.memory_space<vmem>>, vector<1x64xf32>
    %31 = vector.broadcast %30 : vector<1x64xf32> to vector<2x64xf32>
    %32 = arith.addf %29, %31 : vector<2x64xf32>
    %cst_41 = arith.constant 0.000000e+00 : f32
    %33 = vector.broadcast %cst_41 : f32 to vector<2x64xf32>
    %34 = arith.maximumf %32, %33 : vector<2x64xf32>
    %c0_42 = arith.constant 0 : index
    %c0_43 = arith.constant 0 : index
    %35 = vector.load %arg9[%c0_42, %c0_43] : memref<1x64xf32, #tpu.memory_space<vmem>>, vector<1x64xf32>
    %36 = vector.broadcast %35 : vector<1x64xf32> to vector<2x64xf32>
    %37 = arith.mulf %34, %36 : vector<2x64xf32>
    %cst_44 = arith.constant dense<0.000000e+00> : vector<2xf32>
    %38 = vector.multi_reduction <add>, %37, %cst_44 [1] : vector<2x64xf32> to vector<2xf32>
    %39 = vector.shape_cast %38 : vector<2xf32> to vector<2x1xf32>
    %c0_45 = arith.constant 0 : index
    %c0_46 = arith.constant 0 : index
    %40 = vector.load %arg10[%c0_45, %c0_46] : memref<1x1xf32, #tpu.memory_space<vmem>>, vector<1x1xf32>
    %41 = vector.broadcast %40 : vector<1x1xf32> to vector<2x1xf32>
    %42 = arith.addf %39, %41 : vector<2x1xf32>
    %c0_47 = arith.constant 0 : index
    %c0_48 = arith.constant 0 : index
    %43 = vector.load %arg11[%c0_47, %c0_48] : memref<2x1xf32, #tpu.memory_space<vmem>>, vector<2x1xf32>
    tpu.vector_store %arg11[%c0_47, %c0_48], %42 {strides = array<i32>} : memref<2x1xf32, #tpu.memory_space<vmem>>, vector<2x1xf32>,
    return
  }
}

</mosaic_0001>

<bundles_post_ra>
// kernel: tpu_custom_call.1
= control target key start
LH: loop header
LB: loop body
LE: loop exit
PB: predicated region body
PF: predicated region fallthrough
CT: control target
= control target key end

     0   :  { %v5474_v3 = vmov 0.0   ;;  %vm197_vm0 = vcmask 1041408   ;;  %vm88_vm1 = vcmask 146432   ;;  %vm4005_vm2 = vcmask 1045504   ;;  %s6831_s1 = inlined_call_operand.vmem [shape: f32[18,512], index: 1, kind: input, shape index: {}]   ;;  %s6832_s0 = inlined_call_operand.vmem [shape: f32[288,18], index: 0, kind: input, shape index: {}]   ;;  %s6833_s2 = inlined_call_operand.vmem [shape: f32[18,512], index: 2, kind: input, shape index: {}]   ;;  %s6834_s3 = inlined_call_operand.vmem [shape: f32[18,512], index: 3, kind: input, shape index: {}]   ;;  %s6835_s4 = inlined_call_operand.vmem [shape: f32[1,512], index: 4, kind: input, shape index: {}]   ;;  %s6836_s5 = inlined_call_operand.vmem [shape: f32[2,286], index: 5, kind: input, shape index: {}]   ;;  %s6837_s6 = inlined_call_operand.vmem [shape: f32[512,32], index: 6, kind: input, shape index: {}]   ;;  %s6838_s7 = inlined_call_operand.vmem [shape: f32[32,64], index: 7, kind: input, shape index: {}]   ;;  %s6839_s10 = inlined_call_operand.<no memory space> [shape: f32[1,1], index: 10, kind: input, shape index: {}]   ;;  %s6840_s8 = inlined_call_operand.vmem [shape: f32[1,64], index: 8, kind: input, shape index: {}]   ;;  %s6841_s9 = inlined_call_operand.vmem [shape: f32[1,64], index: 9, kind: input, shape index: {}]   ;;  %s6842_s11 = inlined_call_operand.vmem [shape: f32[2,1], index: 11, kind: output, shape index: {}]  }
   0x1   :  { %v77_v0 = vld [vmem:[%s6831_s1 + $0x8] sm:$0xff]  ;;  %v79_v2 = vld [vmem:[%s6831_s1 + $0x18] sm:$0xff]  ;;  %274 = vmatprep.mubr.f32.mxu0 %v5474_v3  ;;  %555 = vmatprep.mubr.f32.mxu1 %v5474_v3  ;;  %v76_v6 = vld [vmem:[%s6831_s1] sm:$0xff]  ;;  %vm5476_vm3 = vmmov 1   ;;  %vm4002_vm5 = vcmask 244736   ;;  %vm5478_vm6 = vmmov 0  }
   0x2   :  { %v81_v1 = vld [vmem:[%s6831_s1 + $0x28] sm:$0xff]  ;;  %v83_v5 = vld [vmem:[%s6831_s1 + $0x38] sm:$0xff]  ;;  %v80_v7 = vld [vmem:[%s6831_s1 + $0x20] sm:$0xff]  ;;  %vm4517_vm7 = vcmask 261120   ;;  %vm4600_vm8 = vcmask 517120   ;;  %vm4612_vm9 = vcmask 1024  }
   0x3   :  { %v4942_v4 = vpack.c.bf16 %v81_v1, %v77_v0  ;;  %v4946_v8 = vpack.c.bf16 %v83_v5, %v79_v2  ;;  %v4944_v9 = vpack.c.bf16 %v80_v7, %v76_v6  ;;  %v78_v10 = vld [vmem:[%s6831_s1 + $0x10] sm:$0xff]  ;;  %v85_v12 = vld [vmem:[%s6831_s1 + $0x48] sm:$0x3]  ;;  %v87_v14 = vld [vmem:[%s6831_s1 + $0x58] sm:$0x3] }
   0x4   :  { %v82_v11 = vld [vmem:[%s6831_s1 + $0x30] sm:$0xff]  ;;  %v84_v15 = vld [vmem:[%s6831_s1 + $0x40] sm:$0x3]  ;;  %v1097_v18 = vld [vmem:[%s6833_s2 + $0x8] sm:$0xff] }
   0x5   :  { %4943 = vmatprep.subr.bf16.mxu0 %v4942_v4  ;;  %v4948_v13 = vpack.c.bf16 %v82_v11, %v78_v10  ;;  %4947 = vmatprep.subr.bf16.mxu1 %v4946_v8  ;;  %v86_v16 = vld [vmem:[%s6831_s1 + $0x50] sm:$0x3]  ;;  %v40_v17 = vld [vmem:[%s6832_s0] sm:$0xff]  ;;  %v1101_v19 = vld [vmem:[%s6833_s2 + $0x28] sm:$0xff] }
   0x6   :  { %4945 = vmatpush1.bf16.msra.mxu0 %v4944_v9  ;;  %v1099_v20 = vld [vmem:[%s6833_s2 + $0x18] sm:$0xff]  ;;  %v1096_v22 = vld [vmem:[%s6833_s2] sm:$0xff]  ;;  %v4950_v24 = vpack.c.bf16 %v1101_v19, %v1097_v18  ;;  %v1098_v25 = vld [vmem:[%s6833_s2 + $0x10] sm:$0xff] }
   0x7   :  { %4949 = vmatpush1.bf16.msra.mxu1 %v4948_v13  ;;  %4618 = vmatprep.subr.msk.mxu0 %vm197_vm0, %v85_v12  ;;  %v1103_v21 = vld [vmem:[%s6833_s2 + $0x38] sm:$0xff]  ;;  %v1100_v23 = vld [vmem:[%s6833_s2 + $0x20] sm:$0xff]  ;;  %v1102_v26 = vld [vmem:[%s6833_s2 + $0x30] sm:$0xff] }
   0x8   :  { %4656 = vmatprep.subr.msk.mxu1 %vm197_vm0, %v87_v14  ;;  %v4954_v27 = vpack.c.bf16 %v1103_v21, %v1099_v20  ;;  %v4952_v28 = vpack.c.bf16 %v1100_v23, %v1096_v22  ;;  %v4956_v29 = vpack.c.bf16 %v1102_v26, %v1098_v25  ;;  %v41_v30 = vld [vmem:[%s6832_s0 + $0x8] sm:$0xff]  ;;  %v42_v31 = vld [vmem:[%s6832_s0 + $0x10] sm:$0xff]  ;;  %v1107_v33 = vld [vmem:[%s6833_s2 + $0x58] sm:$0x3] }
   0x9   :  { %v1105_v32 = vld [vmem:[%s6833_s2 + $0x48] sm:$0x3]  ;;  %v1104_v34 = vld [vmem:[%s6833_s2 + $0x40] sm:$0x3]  ;;  %v1106_v35 = vld [vmem:[%s6833_s2 + $0x50] sm:$0x3] }
   0xa   :  { %4619 = vmatpush1.msk.msra.mxu0 %vm197_vm0, %v84_v15  ;;  %v43_v36 = vld [vmem:[%s6832_s0 + $0x18] sm:$0xff]  ;;  %v44_v37 = vld [vmem:[%s6832_s0 + $0x20] sm:$0xff]  ;;  %v45_v38 = vld [vmem:[%s6832_s0 + $0x28] sm:$0xff] }
   0xb   :  { %4657 = vmatpush1.msk.msra.mxu1 %vm197_vm0, %v86_v16  ;;  %4620 = vmatmul.mubr.msk.f32.vlgmr.msra.gmra.mrb[0].mxu0 %vm88_vm1, %v40_v17  ;;  %v46_v39 = vld [vmem:[%s6832_s0 + $0x30] sm:$0xff]  ;;  %v47_v40 = vld [vmem:[%s6832_s0 + $0x38] sm:$0xff]  ;;  %v2259_v41 = vld [vmem:[%s6834_s3 + $0x8] sm:$0xff] }
   0xc   :  { %4658 = vmatmul.mubr.msk.f32.vlgmr.msra.gmra.mrb[0].mxu1 %vm88_vm1, %v40_v17  ;;  %280 = vmatprep.mubr.f32.mxu0 %v5474_v3  ;;  %v2263_v42 = vld [vmem:[%s6834_s3 + $0x28] sm:$0xff]  ;;  %v2261_v43 = vld [vmem:[%s6834_s3 + $0x18] sm:$0xff]  ;;  %v48_v47 = vld [vmem:[%s6832_s0 + $0x40] sm:$0xff] }
   0xd   :  { %561 = vmatprep.mubr.f32.mxu1 %v5474_v3  ;;  %4951 = vmatprep.subr.bf16.mxu0 %v4950_v24  ;;  %v4958_v44 = vpack.c.bf16 %v2263_v42, %v2259_v41  ;;  %v2265_v45 = vld [vmem:[%s6834_s3 + $0x38] sm:$0xff]  ;;  %v49_v48 = vld [vmem:[%s6832_s0 + $0x48] sm:$0xff]  ;;  %v50_v49 = vld [vmem:[%s6832_s0 + $0x50] sm:$0xff] }
   0xe   :  { %4955 = vmatprep.subr.bf16.mxu1 %v4954_v27  ;;  %4953 = vmatpush1.bf16.msra.mxu0 %v4952_v28  ;;  %v4962_v46 = vpack.c.bf16 %v2265_v45, %v2261_v43  ;;  %v51_v50 = vld [vmem:[%s6832_s0 + $0x58] sm:$0xff]  ;;  %v52_v51 = vld [vmem:[%s6832_s0 + $0x60] sm:$0xff]  ;;  %v53_v52 = vld [vmem:[%s6832_s0 + $0x68] sm:$0xff] }
   0xf   :  { %4621 = vmatmul.mubr.msk.f32.gmra.mrb[2].mxu0 %vm88_vm1, %v41_v30  ;;  %4957 = vmatpush1.bf16.msra.mxu1 %v4956_v29  ;;  %v54_v53 = vld [vmem:[%s6832_s0 + $0x70] sm:$0xff]  ;;  %v55_v54 = vld [vmem:[%s6832_s0 + $0x78] sm:$0xff]  ;;  %v56_v55 = vld [vmem:[%s6832_s0 + $0x80] sm:$0xff] }
  0x10   :  { %4659 = vmatmul.mubr.msk.f32.gmra.mrb[2].mxu1 %vm88_vm1, %v41_v30  ;;  %286 = vmatprep.mubr.f32.mxu0 %v5474_v3  ;;  %v57_v56 = vld [vmem:[%s6832_s0 + $0x88] sm:$0xff]  ;;  %v58_v57 = vld [vmem:[%s6832_s0 + $0x90] sm:$0xff]  ;;  %v59_v58 = vld [vmem:[%s6832_s0 + $0x98] sm:$0xff] }
  0x11   :  { %567 = vmatprep.mubr.f32.mxu1 %v5474_v3  ;;  %4694 = vmatprep.subr.msk.mxu0 %vm197_vm0, %v1105_v32  ;;  %v60_v59 = vld [vmem:[%s6832_s0 + $0xa0] sm:$0xff]  ;;  %v61_v60 = vld [vmem:[%s6832_s0 + $0xa8] sm:$0xff]  ;;  %v62_v61 = vld [vmem:[%s6832_s0 + $0xb0] sm:$0xff] }
  0x12   :  { %4732 = vmatprep.subr.msk.mxu1 %vm197_vm0, %v1107_v33  ;;  %4695 = vmatpush1.msk.msra.mxu0 %vm197_vm0, %v1104_v34  ;;  %v63_v62 = vld [vmem:[%s6832_s0 + $0xb8] sm:$0xff]  ;;  %v64_v63 = vld [vmem:[%s6832_s0 + $0xc0] sm:$0xff]  ;;  %v65_v0 = vld [vmem:[%s6832_s0 + $0xc8] sm:$0xff] }
  0x13   :  { %4622 = vmatmul.mubr.msk.f32.gmra.mrb[4].mxu0 %vm88_vm1, %v42_v31  ;;  %4733 = vmatpush1.msk.msra.mxu1 %vm197_vm0, %v1106_v35  ;;  %v66_v1 = vld [vmem:[%s6832_s0 + $0xd0] sm:$0xff]  ;;  %v67_v2 = vld [vmem:[%s6832_s0 + $0xd8] sm:$0xff]  ;;  %v68_v4 = vld [vmem:[%s6832_s0 + $0xe0] sm:$0xff] }
  0x14   :  { %4660 = vmatmul.mubr.msk.f32.gmra.mrb[4].mxu1 %vm88_vm1, %v42_v31  ;;  %292 = vmatprep.mubr.f32.mxu0 %v5474_v3  ;;  %v69_v5 = vld [vmem:[%s6832_s0 + $0xe8] sm:$0xff]  ;;  %v70_v6 = vld [vmem:[%s6832_s0 + $0xf0] sm:$0xff]  ;;  %v71_v7 = vld [vmem:[%s6832_s0 + $0xf8] sm:$0xff] }
  0x15   :  { %573 = vmatprep.mubr.f32.mxu1 %v5474_v3  ;;  %4959 = vmatprep.subr.bf16.mxu0 %v4958_v44  ;;  %v72_v8 = vld [vmem:[%s6832_s0 + $0x100] sm:$0xff]  ;;  %v73_v9 = vld [vmem:[%s6832_s0 + $0x108] sm:$0xff]  ;;  %v74_v10 = vld [vmem:[%s6832_s0 + $0x110] sm:$0xff] }
  0x16   :  { %4963 = vmatprep.subr.bf16.mxu1 %v4962_v46  ;;  %v75_v11 = vld [vmem:[%s6832_s0 + $0x118] sm:$0x3f]  ;;  %v2258_v12 = vld [vmem:[%s6834_s3] sm:$0xff]  ;;  %v2260_v14 = vld [vmem:[%s6834_s3 + $0x10] sm:$0xff] }
  0x17   :  { %4623 = vmatmul.mubr.msk.f32.gmra.mrb[6].mxu0 %vm88_vm1, %v43_v36  ;;  %v2262_v13 = vld [vmem:[%s6834_s3 + $0x20] sm:$0xff]  ;;  %v2264_v15 = vld [vmem:[%s6834_s3 + $0x30] sm:$0xff]  ;;  %v2267_v19 = vld [vmem:[%s6834_s3 + $0x48] sm:$0x3] }
  0x18   :  { %4661 = vmatmul.mubr.msk.f32.gmra.mrb[6].mxu1 %vm88_vm1, %v43_v36  ;;  %298 = vmatprep.mubr.f32.mxu0 %v5474_v3  ;;  %v1060_v16 = vld [vmem:[%s6832_s0 + $0x1] sm:$0xff]  ;;  %v4960_v17 = vpack.c.bf16 %v2262_v13, %v2258_v12  ;;  %v4964_v18 = vpack.c.bf16 %v2264_v15, %v2260_v14  ;;  %v1061_v20 = vld [vmem:[%s6832_s0 + $0x9] sm:$0xff]  ;;  %v2269_v21 = vld [vmem:[%s6834_s3 + $0x58] sm:$0x3] }
  0x19   :  { %579 = vmatprep.mubr.f32.mxu1 %v5474_v3  ;;  %v2266_v22 = vld [vmem:[%s6834_s3 + $0x40] sm:$0x3]  ;;  %v2268_v23 = vld [vmem:[%s6834_s3 + $0x50] sm:$0x3]  ;;  %vm6598_vm4 = vmpackc.low %vm4005_vm2, %vm5476_vm3 }
  0x1a   :  { %v1062_v24 = vld [vmem:[%s6832_s0 + $0x11] sm:$0xff]  ;;  %v1063_v25 = vld [vmem:[%s6832_s0 + $0x19] sm:$0xff]  ;;  %v1064_v26 = vld [vmem:[%s6832_s0 + $0x21] sm:$0xff] }
  0x1b   :  { %4624 = vmatmul.mubr.msk.f32.gmra.mrb[8].mxu0 %vm88_vm1, %v44_v37  ;;  %v1065_v27 = vld [vmem:[%s6832_s0 + $0x29] sm:$0xff]  ;;  %v1066_v28 = vld [vmem:[%s6832_s0 + $0x31] sm:$0xff]  ;;  %v1067_v29 = vld [vmem:[%s6832_s0 + $0x39] sm:$0xff] }
  0x1c   :  { %4662 = vmatmul.mubr.msk.f32.gmra.mrb[8].mxu1 %vm88_vm1, %v44_v37  ;;  %304 = vmatprep.mubr.f32.mxu0 %v5474_v3  ;;  %v1068_v30 = vld [vmem:[%s6832_s0 + $0x41] sm:$0xff]  ;;  %v1069_v31 = vld [vmem:[%s6832_s0 + $0x49] sm:$0xff]  ;;  %v1070_v32 = vld [vmem:[%s6832_s0 + $0x51] sm:$0xff] }
  0x1d   :  { %585 = vmatprep.mubr.f32.mxu1 %v5474_v3  ;;  %v1071_v33 = vld [vmem:[%s6832_s0 + $0x59] sm:$0xff]  ;;  %v1072_v34 = vld [vmem:[%s6832_s0 + $0x61] sm:$0xff]  ;;  %v1073_v35 = vld [vmem:[%s6832_s0 + $0x69] sm:$0xff] }
  0x1e   :  { %v1074_v36 = vld [vmem:[%s6832_s0 + $0x71] sm:$0xff]  ;;  %v1075_v37 = vld [vmem:[%s6832_s0 + $0x79] sm:$0xff]  ;;  %v1080_v42 = vld [vmem:[%s6832_s0 + $0xa1] sm:$0xff] }
  0x1f   :  { %4625 = vmatmul.mubr.msk.f32.gmra.mrb[10].mxu0 %vm88_vm1, %v45_v38  ;;  %v1079_v41 = vld [vmem:[%s6832_s0 + $0x99] sm:$0xff]  ;;  %v1081_v43 = vld [vmem:[%s6832_s0 + $0xa9] sm:$0xff]  ;;  %v1082_v44 = vld [vmem:[%s6832_s0 + $0xb1] sm:$0xff] }
  0x20   :  { %4663 = vmatmul.mubr.msk.f32.gmra.mrb[10].mxu1 %vm88_vm1, %v45_v38  ;;  %310 = vmatprep.mubr.f32.mxu0 %v5474_v3  ;;  %v1076_v38 = vld [vmem:[%s6832_s0 + $0x81] sm:$0xff]  ;;  %v1083_v45 = vld [vmem:[%s6832_s0 + $0xb9] sm:$0xff] }
  0x21   :  { %591 = vmatprep.mubr.f32.mxu1 %v5474_v3  ;;  %v1084_v46 = vld [vmem:[%s6832_s0 + $0xc1] sm:$0xff] }
  0x23   :  { %4626 = vmatmul.mubr.msk.f32.gmra.mrb[12].mxu0 %vm88_vm1, %v46_v39 }
  0x24   :  { %4664 = vmatmul.mubr.msk.f32.gmra.mrb[12].mxu1 %vm88_vm1, %v46_v39  ;;  %316 = vmatprep.mubr.f32.mxu0 %v5474_v3  ;;  %v1077_v39 = vld [vmem:[%s6832_s0 + $0x89] sm:$0xff] }
  0x25   :  { %597 = vmatprep.mubr.f32.mxu1 %v5474_v3 }
  0x27   :  { %4627 = vmatmul.mubr.msk.f32.gmra.mrb[14].mxu0 %vm88_vm1, %v47_v40 }
  0x28   :  { %4665 = vmatmul.mubr.msk.f32.gmra.mrb[14].mxu1 %vm88_vm1, %v47_v40  ;;  %322 = vmatprep.mubr.f32.mxu0 %v5474_v3  ;;  %v1078_v40 = vld [vmem:[%s6832_s0 + $0x91] sm:$0xff] }
  0x29   :  { %603 = vmatprep.mubr.f32.mxu1 %v5474_v3 }
  0x2b   :  { %4628 = vmatmul.mubr.msk.f32.gmra.mrb[16].mxu0 %vm88_vm1, %v48_v47 }
  0x2c   :  { %4666 = vmatmul.mubr.msk.f32.gmra.mrb[16].mxu1 %vm88_vm1, %v48_v47  ;;  %328 = vmatprep.mubr.f32.mxu0 %v5474_v3  ;;  %v1085_v47 = vld [vmem:[%s6832_s0 + $0xc9] sm:$0xff] }
  0x2d   :  { %609 = vmatprep.mubr.f32.mxu1 %v5474_v3 }
  0x2f   :  { %4629 = vmatmul.mubr.msk.f32.gmra.mrb[18].mxu0 %vm88_vm1, %v49_v48 }
  0x30   :  { %4667 = vmatmul.mubr.msk.f32.gmra.mrb[18].mxu1 %vm88_vm1, %v49_v48  ;;  %334 = vmatprep.mubr.f32.mxu0 %v5474_v3  ;;  %v1086_v48 = vld [vmem:[%s6832_s0 + $0xd1] sm:$0xff] }
  0x31   :  { %615 = vmatprep.mubr.f32.mxu1 %v5474_v3 }
  0x33   :  { %4630 = vmatmul.mubr.msk.f32.gmra.mrb[20].mxu0 %vm88_vm1, %v50_v49 }
  0x34   :  { %4668 = vmatmul.mubr.msk.f32.gmra.mrb[20].mxu1 %vm88_vm1, %v50_v49  ;;  %340 = vmatprep.mubr.f32.mxu0 %v5474_v3  ;;  %v1087_v49 = vld [vmem:[%s6832_s0 + $0xd9] sm:$0xff] }
  0x35   :  { %621 = vmatprep.mubr.f32.mxu1 %v5474_v3 }
  0x37   :  { %4631 = vmatmul.mubr.msk.f32.gmra.mrb[22].mxu0 %vm88_vm1, %v51_v50 }
  0x38   :  { %4669 = vmatmul.mubr.msk.f32.gmra.mrb[22].mxu1 %vm88_vm1, %v51_v50  ;;  %346 = vmatprep.mubr.f32.mxu0 %v5474_v3  ;;  %v1088_v50 = vld [vmem:[%s6832_s0 + $0xe1] sm:$0xff] }
  0x39   :  { %627 = vmatprep.mubr.f32.mxu1 %v5474_v3 }
  0x3b   :  { %4632 = vmatmul.mubr.msk.f32.gmra.mrb[24].mxu0 %vm88_vm1, %v52_v51 }
  0x3c   :  { %4670 = vmatmul.mubr.msk.f32.gmra.mrb[24].mxu1 %vm88_vm1, %v52_v51  ;;  %352 = vmatprep.mubr.f32.mxu0 %v5474_v3  ;;  %v1089_v51 = vld [vmem:[%s6832_s0 + $0xe9] sm:$0xff] }
  0x3d   :  { %633 = vmatprep.mubr.f32.mxu1 %v5474_v3 }
  0x3f   :  { %4633 = vmatmul.mubr.msk.f32.gmra.mrb[26].mxu0 %vm88_vm1, %v53_v52 }
  0x40   :  { %4671 = vmatmul.mubr.msk.f32.gmra.mrb[26].mxu1 %vm88_vm1, %v53_v52  ;;  %358 = vmatprep.mubr.f32.mxu0 %v5474_v3  ;;  %v1090_v52 = vld [vmem:[%s6832_s0 + $0xf1] sm:$0xff] }
  0x41   :  { %639 = vmatprep.mubr.f32.mxu1 %v5474_v3 }
  0x43   :  { %4634 = vmatmul.mubr.msk.f32.gmra.mrb[28].mxu0 %vm88_vm1, %v54_v53 }
  0x44   :  { %4672 = vmatmul.mubr.msk.f32.gmra.mrb[28].mxu1 %vm88_vm1, %v54_v53  ;;  %364 = vmatprep.mubr.f32.mxu0 %v5474_v3  ;;  %v1091_v53 = vld [vmem:[%s6832_s0 + $0xf9] sm:$0xff] }
  0x45   :  { %645 = vmatprep.mubr.f32.mxu1 %v5474_v3 }
  0x47   :  { %4635 = vmatmul.mubr.msk.f32.gmra.mrb[30].mxu0 %vm88_vm1, %v55_v54 }
  0x48   :  { %4673 = vmatmul.mubr.msk.f32.gmra.mrb[30].mxu1 %vm88_vm1, %v55_v54  ;;  %370 = vmatprep.mubr.f32.mxu0 %v5474_v3  ;;  %v1092_v54 = vld [vmem:[%s6832_s0 + $0x101] sm:$0xff] }
  0x49   :  { %651 = vmatprep.mubr.f32.mxu1 %v5474_v3 }
  0x4b   :  { %4636 = vmatmul.mubr.msk.f32.gmra.mrb[32].mxu0 %vm88_vm1, %v56_v55 }
  0x4c   :  { %4674 = vmatmul.mubr.msk.f32.gmra.mrb[32].mxu1 %vm88_vm1, %v56_v55  ;;  %376 = vmatprep.mubr.f32.mxu0 %v5474_v3  ;;  %v1093_v55 = vld [vmem:[%s6832_s0 + $0x109] sm:$0xff] }
  0x4d   :  { %657 = vmatprep.mubr.f32.mxu1 %v5474_v3 }
  0x4f   :  { %4637 = vmatmul.mubr.msk.f32.gmra.mrb[34].mxu0 %vm88_vm1, %v57_v56 }
  0x50   :  { %4675 = vmatmul.mubr.msk.f32.gmra.mrb[34].mxu1 %vm88_vm1, %v57_v56  ;;  %382 = vmatprep.mubr.f32.mxu0 %v5474_v3  ;;  %v1094_v56 = vld [vmem:[%s6832_s0 + $0x111] sm:$0xff] }
  0x51   :  { %663 = vmatprep.mubr.f32.mxu1 %v5474_v3 }
  0x53   :  { %4638 = vmatmul.mubr.msk.f32.gmra.mrb[36].mxu0 %vm88_vm1, %v58_v57 }
  0x54   :  { %4676 = vmatmul.mubr.msk.f32.gmra.mrb[36].mxu1 %vm88_vm1, %v58_v57  ;;  %388 = vmatprep.mubr.f32.mxu0 %v5474_v3  ;;  %v1095_v57 = vld [vmem:[%s6832_s0 + $0x119] sm:$0x3f] }
  0x55   :  { %669 = vmatprep.mubr.f32.mxu1 %v5474_v3 }
  0x57   :  { %4639 = vmatmul.mubr.msk.f32.gmra.mrb[38].mxu0 %vm88_vm1, %v59_v58 }
  0x58   :  { %4677 = vmatmul.mubr.msk.f32.gmra.mrb[38].mxu1 %vm88_vm1, %v59_v58  ;;  %394 = vmatprep.mubr.f32.mxu0 %v5474_v3  ;;  %v2222_v58 = vld [vmem:[%s6832_s0 + $0x2] sm:$0xff] }
  0x59   :  { %675 = vmatprep.mubr.f32.mxu1 %v5474_v3 }
  0x5b   :  { %4640 = vmatmul.mubr.msk.f32.gmra.mrb[40].mxu0 %vm88_vm1, %v60_v59 }
  0x5c   :  { %4678 = vmatmul.mubr.msk.f32.gmra.mrb[40].mxu1 %vm88_vm1, %v60_v59  ;;  %400 = vmatprep.mubr.f32.mxu0 %v5474_v3  ;;  %v2223_v59 = vld [vmem:[%s6832_s0 + $0xa] sm:$0xff] }
  0x5d   :  { %681 = vmatprep.mubr.f32.mxu1 %v5474_v3 }
  0x5f   :  { %4641 = vmatmul.mubr.msk.f32.gmra.mrb[42].mxu0 %vm88_vm1, %v61_v60 }
  0x60   :  { %4679 = vmatmul.mubr.msk.f32.gmra.mrb[42].mxu1 %vm88_vm1, %v61_v60  ;;  %406 = vmatprep.mubr.f32.mxu0 %v5474_v3  ;;  %v2224_v60 = vld [vmem:[%s6832_s0 + $0x12] sm:$0xff] }
  0x61   :  { %687 = vmatprep.mubr.f32.mxu1 %v5474_v3 }
  0x63   :  { %4642 = vmatmul.mubr.msk.f32.gmra.mrb[44].mxu0 %vm88_vm1, %v62_v61 }
  0x64   :  { %4680 = vmatmul.mubr.msk.f32.gmra.mrb[44].mxu1 %vm88_vm1, %v62_v61  ;;  %412 = vmatprep.mubr.f32.mxu0 %v5474_v3  ;;  %v2225_v61 = vld [vmem:[%s6832_s0 + $0x1a] sm:$0xff] }
  0x65   :  { %693 = vmatprep.mubr.f32.mxu1 %v5474_v3 }
  0x67   :  { %4643 = vmatmul.mubr.msk.f32.gmra.mrb[46].mxu0 %vm88_vm1, %v63_v62 }
  0x68   :  { %4681 = vmatmul.mubr.msk.f32.gmra.mrb[46].mxu1 %vm88_vm1, %v63_v62  ;;  %418 = vmatprep.mubr.f32.mxu0 %v5474_v3  ;;  %v2226_v62 = vld [vmem:[%s6832_s0 + $0x22] sm:$0xff] }
  0x69   :  { %699 = vmatprep.mubr.f32.mxu1 %v5474_v3 }
  0x6b   :  { %4644 = vmatmul.mubr.msk.f32.gmra.mrb[48].mxu0 %vm88_vm1, %v64_v63 }
  0x6c   :  { %4682 = vmatmul.mubr.msk.f32.gmra.mrb[48].mxu1 %vm88_vm1, %v64_v63  ;;  %424 = vmatprep.mubr.f32.mxu0 %v5474_v3  ;;  %v2227_v63 = vld [vmem:[%s6832_s0 + $0x2a] sm:$0xff] }
  0x6d   :  { %705 = vmatprep.mubr.f32.mxu1 %v5474_v3 }
  0x6f   :  { %4645 = vmatmul.mubr.msk.f32.gmra.mrb[50].mxu0 %vm88_vm1, %v65_v0 }
  0x70   :  { %4683 = vmatmul.mubr.msk.f32.gmra.mrb[50].mxu1 %vm88_vm1, %v65_v0  ;;  %430 = vmatprep.mubr.f32.mxu0 %v5474_v3  ;;  %v2228_v0 = vld [vmem:[%s6832_s0 + $0x32] sm:$0xff] }
  0x71   :  { %711 = vmatprep.mubr.f32.mxu1 %v5474_v3 }
  0x73   :  { %4646 = vmatmul.mubr.msk.f32.gmra.mrb[52].mxu0 %vm88_vm1, %v66_v1 }
  0x74   :  { %4684 = vmatmul.mubr.msk.f32.gmra.mrb[52].mxu1 %vm88_vm1, %v66_v1  ;;  %436 = vmatprep.mubr.f32.mxu0 %v5474_v3  ;;  %v2229_v1 = vld [vmem:[%s6832_s0 + $0x3a] sm:$0xff] }
  0x75   :  { %717 = vmatprep.mubr.f32.mxu1 %v5474_v3 }
  0x77   :  { %4647 = vmatmul.mubr.msk.f32.gmra.mrb[54].mxu0 %vm88_vm1, %v67_v2 }
  0x78   :  { %4685 = vmatmul.mubr.msk.f32.gmra.mrb[54].mxu1 %vm88_vm1, %v67_v2  ;;  %442 = vmatprep.mubr.f32.mxu0 %v5474_v3  ;;  %v2230_v2 = vld [vmem:[%s6832_s0 + $0x42] sm:$0xff] }
  0x79   :  { %723 = vmatprep.mubr.f32.mxu1 %v5474_v3 }
  0x7b   :  { %4648 = vmatmul.mubr.msk.f32.gmra.mrb[56].mxu0 %vm88_vm1, %v68_v4 }
  0x7c   :  { %4686 = vmatmul.mubr.msk.f32.gmra.mrb[56].mxu1 %vm88_vm1, %v68_v4  ;;  %448 = vmatprep.mubr.f32.mxu0 %v5474_v3  ;;  %v2231_v4 = vld [vmem:[%s6832_s0 + $0x4a] sm:$0xff] }
  0x7d   :  { %729 = vmatprep.mubr.f32.mxu1 %v5474_v3 }
  0x7f   :  { %4649 = vmatmul.mubr.msk.f32.gmra.mrb[58].mxu0 %vm88_vm1, %v69_v5 }
  0x80   :  { %4687 = vmatmul.mubr.msk.f32.gmra.mrb[58].mxu1 %vm88_vm1, %v69_v5  ;;  %454 = vmatprep.mubr.f32.mxu0 %v5474_v3  ;;  %v2232_v5 = vld [vmem:[%s6832_s0 + $0x52] sm:$0xff] }
  0x81   :  { %735 = vmatprep.mubr.f32.mxu1 %v5474_v3 }
  0x83   :  { %4650 = vmatmul.mubr.msk.f32.gmra.mrb[60].mxu0 %vm88_vm1, %v70_v6 }
  0x84   :  { %4688 = vmatmul.mubr.msk.f32.gmra.mrb[60].mxu1 %vm88_vm1, %v70_v6  ;;  %460 = vmatprep.mubr.f32.mxu0 %v5474_v3  ;;  %v2233_v6 = vld [vmem:[%s6832_s0 + $0x5a] sm:$0xff] }
  0x85   :  { %741 = vmatprep.mubr.f32.mxu1 %v5474_v3 }
  0x87   :  { %4651 = vmatmul.mubr.msk.f32.gmra.mrb[62].mxu0 %vm88_vm1, %v71_v7 }
  0x88   :  { %4689 = vmatmul.mubr.msk.f32.gmra.mrb[62].mxu1 %vm88_vm1, %v71_v7  ;;  %466 = vmatprep.mubr.f32.mxu0 %v5474_v3  ;;  %v2234_v7 = vld [vmem:[%s6832_s0 + $0x62] sm:$0xff] }
  0x89   :  { %747 = vmatprep.mubr.f32.mxu1 %v5474_v3 }
  0x8b   :  { %4652 = vmatmul.mubr.msk.f32.gmra.mrb[64].mxu0 %vm88_vm1, %v72_v8 }
  0x8c   :  { %4690 = vmatmul.mubr.msk.f32.gmra.mrb[64].mxu1 %vm88_vm1, %v72_v8  ;;  %472 = vmatprep.mubr.f32.mxu0 %v5474_v3  ;;  %v2235_v8 = vld [vmem:[%s6832_s0 + $0x6a] sm:$0xff] }
  0x8d   :  { %753 = vmatprep.mubr.f32.mxu1 %v5474_v3 }
  0x8f   :  { %4653 = vmatmul.mubr.msk.f32.gmra.mrb[66].mxu0 %vm88_vm1, %v73_v9 }
  0x90   :  { %4691 = vmatmul.mubr.msk.f32.gmra.mrb[66].mxu1 %vm88_vm1, %v73_v9  ;;  %478 = vmatprep.mubr.f32.mxu0 %v5474_v3  ;;  %v2236_v9 = vld [vmem:[%s6832_s0 + $0x72] sm:$0xff] }
  0x91   :  { %759 = vmatprep.mubr.f32.mxu1 %v5474_v3 }
  0x93   :  { %4654 = vmatmul.mubr.msk.f32.gmra.mrb[68].mxu0 %vm88_vm1, %v74_v10 }
  0x94   :  { %4692 = vmatmul.mubr.msk.f32.gmra.mrb[68].mxu1 %vm88_vm1, %v74_v10  ;;  %484 = vmatprep.mubr.f32.mxu0 %v5474_v3  ;;  %v2237_v10 = vld [vmem:[%s6832_s0 + $0x7a] sm:$0xff] }
  0x95   :  { %765 = vmatprep.mubr.f32.mxu1 %v5474_v3 }
  0x97   :  { %4655 = vmatmul.mubr.msk.f32.gmra.mrb[70].mxu0 %vm88_vm1, %v75_v11 }
  0x98   :  { %4693 = vmatmul.mubr.msk.f32.gmra.mrb[70].mxu1 %vm88_vm1, %v75_v11  ;;  %1292 = vmatprep.mubr.f32.mxu0 %v5474_v3  ;;  %v2238_v11 = vld [vmem:[%s6832_s0 + $0x82] sm:$0xff] }
  0x99   :  { %1573 = vmatprep.mubr.f32.mxu1 %v5474_v3 }
  0x9b   :  { %4696 = vmatmul.mubr.msk.f32.vlgmr.msra.gmra.mrb[0].mxu0 %vm88_vm1, %v1060_v16 }
  0x9c   :  { %4734 = vmatmul.mubr.msk.f32.vlgmr.msra.gmra.mrb[0].mxu1 %vm88_vm1, %v1060_v16  ;;  %1298 = vmatprep.mubr.f32.mxu0 %v5474_v3  ;;  %v2239_v16 = vld [vmem:[%s6832_s0 + $0x8a] sm:$0xff] }
  0x9d   :  { %1579 = vmatprep.mubr.f32.mxu1 %v5474_v3  ;;  %4961 = vmatpush1.bf16.msra.mxu0 %v4960_v17  ;;  %v2240_v17 = vld [vmem:[%s6832_s0 + $0x92] sm:$0xff] }
  0x9e   :  { %4965 = vmatpush1.bf16.msra.mxu1 %v4964_v18  ;;  %4770 = vmatprep.subr.msk.mxu0 %vm197_vm0, %v2267_v19  ;;  %v2241_v18 = vld [vmem:[%s6832_s0 + $0x9a] sm:$0xff]  ;;  %v2242_v19 = vld [vmem:[%s6832_s0 + $0xa2] sm:$0xff] }
  0x9f   :  { %4697 = vmatmul.mubr.msk.f32.gmra.mrb[2].mxu0 %vm88_vm1, %v1061_v20  ;;  %4808 = vmatprep.subr.msk.mxu1 %vm197_vm0, %v2269_v21  ;;  %v2244_v21 = vld [vmem:[%s6832_s0 + $0xb2] sm:$0xff] }
  0xa0   :  { %4735 = vmatmul.mubr.msk.f32.gmra.mrb[2].mxu1 %vm88_vm1, %v1061_v20  ;;  %1304 = vmatprep.mubr.f32.mxu0 %v5474_v3  ;;  %v2243_v20 = vld [vmem:[%s6832_s0 + $0xaa] sm:$0xff] }
  0xa1   :  { %1585 = vmatprep.mubr.f32.mxu1 %v5474_v3  ;;  %4771 = vmatpush1.msk.msra.mxu0 %vm197_vm0, %v2266_v22  ;;  %v2245_v22 = vld [vmem:[%s6832_s0 + $0xba] sm:$0xff] }
  0xa2   :  { %4809 = vmatpush1.msk.msra.mxu1 %vm197_vm0, %v2268_v23  ;;  %v2246_v23 = vld [vmem:[%s6832_s0 + $0xc2] sm:$0xff] }
  0xa3   :  { %4698 = vmatmul.mubr.msk.f32.gmra.mrb[4].mxu0 %vm88_vm1, %v1062_v24 }
  0xa4   :  { %4736 = vmatmul.mubr.msk.f32.gmra.mrb[4].mxu1 %vm88_vm1, %v1062_v24  ;;  %1310 = vmatprep.mubr.f32.mxu0 %v5474_v3  ;;  %v2247_v24 = vld [vmem:[%s6832_s0 + $0xca] sm:$0xff] }
  0xa5   :  { %1591 = vmatprep.mubr.f32.mxu1 %v5474_v3 }
  0xa7   :  { %4699 = vmatmul.mubr.msk.f32.gmra.mrb[6].mxu0 %vm88_vm1, %v1063_v25 }
  0xa8   :  { %4737 = vmatmul.mubr.msk.f32.gmra.mrb[6].mxu1 %vm88_vm1, %v1063_v25  ;;  %1316 = vmatprep.mubr.f32.mxu0 %v5474_v3  ;;  %v2248_v25 = vld [vmem:[%s6832_s0 + $0xd2] sm:$0xff] }
  0xa9   :  { %1597 = vmatprep.mubr.f32.mxu1 %v5474_v3 }
  0xab   :  { %4700 = vmatmul.mubr.msk.f32.gmra.mrb[8].mxu0 %vm88_vm1, %v1064_v26 }
  0xac   :  { %4738 = vmatmul.mubr.msk.f32.gmra.mrb[8].mxu1 %vm88_vm1, %v1064_v26  ;;  %1322 = vmatprep.mubr.f32.mxu0 %v5474_v3  ;;  %v2249_v26 = vld [vmem:[%s6832_s0 + $0xda] sm:$0xff] }
  0xad   :  { %1603 = vmatprep.mubr.f32.mxu1 %v5474_v3 }
  0xaf   :  { %4701 = vmatmul.mubr.msk.f32.gmra.mrb[10].mxu0 %vm88_vm1, %v1065_v27 }
  0xb0   :  { %4739 = vmatmul.mubr.msk.f32.gmra.mrb[10].mxu1 %vm88_vm1, %v1065_v27  ;;  %1328 = vmatprep.mubr.f32.mxu0 %v5474_v3  ;;  %v2250_v27 = vld [vmem:[%s6832_s0 + $0xe2] sm:$0xff] }
  0xb1   :  { %1609 = vmatprep.mubr.f32.mxu1 %v5474_v3 }
  0xb3   :  { %4702 = vmatmul.mubr.msk.f32.gmra.mrb[12].mxu0 %vm88_vm1, %v1066_v28 }
  0xb4   :  { %4740 = vmatmul.mubr.msk.f32.gmra.mrb[12].mxu1 %vm88_vm1, %v1066_v28  ;;  %1334 = vmatprep.mubr.f32.mxu0 %v5474_v3  ;;  %v2251_v28 = vld [vmem:[%s6832_s0 + $0xea] sm:$0xff] }
  0xb5   :  { %1615 = vmatprep.mubr.f32.mxu1 %v5474_v3 }
  0xb7   :  { %4703 = vmatmul.mubr.msk.f32.gmra.mrb[14].mxu0 %vm88_vm1, %v1067_v29 }
  0xb8   :  { %4741 = vmatmul.mubr.msk.f32.gmra.mrb[14].mxu1 %vm88_vm1, %v1067_v29  ;;  %1340 = vmatprep.mubr.f32.mxu0 %v5474_v3  ;;  %v2252_v29 = vld [vmem:[%s6832_s0 + $0xf2] sm:$0xff] }
  0xb9   :  { %1621 = vmatprep.mubr.f32.mxu1 %v5474_v3 }
  0xbb   :  { %4704 = vmatmul.mubr.msk.f32.gmra.mrb[16].mxu0 %vm88_vm1, %v1068_v30 }
  0xbc   :  { %4742 = vmatmul.mubr.msk.f32.gmra.mrb[16].mxu1 %vm88_vm1, %v1068_v30  ;;  %1346 = vmatprep.mubr.f32.mxu0 %v5474_v3  ;;  %v2253_v30 = vld [vmem:[%s6832_s0 + $0xfa] sm:$0xff] }
  0xbd   :  { %1627 = vmatprep.mubr.f32.mxu1 %v5474_v3 }
  0xbf   :  { %4705 = vmatmul.mubr.msk.f32.gmra.mrb[18].mxu0 %vm88_vm1, %v1069_v31 }
  0xc0   :  { %4743 = vmatmul.mubr.msk.f32.gmra.mrb[18].mxu1 %vm88_vm1, %v1069_v31  ;;  %1352 = vmatprep.mubr.f32.mxu0 %v5474_v3  ;;  %v2254_v31 = vld [vmem:[%s6832_s0 + $0x102] sm:$0xff] }
  0xc1   :  { %1633 = vmatprep.mubr.f32.mxu1 %v5474_v3 }
  0xc3   :  { %4706 = vmatmul.mubr.msk.f32.gmra.mrb[20].mxu0 %vm88_vm1, %v1070_v32 }
  0xc4   :  { %4744 = vmatmul.mubr.msk.f32.gmra.mrb[20].mxu1 %vm88_vm1, %v1070_v32  ;;  %1358 = vmatprep.mubr.f32.mxu0 %v5474_v3  ;;  %v2255_v32 = vld [vmem:[%s6832_s0 + $0x10a] sm:$0xff] }
  0xc5   :  { %1639 = vmatprep.mubr.f32.mxu1 %v5474_v3 }
  0xc7   :  { %4707 = vmatmul.mubr.msk.f32.gmra.mrb[22].mxu0 %vm88_vm1, %v1071_v33 }
  0xc8   :  { %4745 = vmatmul.mubr.msk.f32.gmra.mrb[22].mxu1 %vm88_vm1, %v1071_v33  ;;  %1364 = vmatprep.mubr.f32.mxu0 %v5474_v3  ;;  %v2256_v33 = vld [vmem:[%s6832_s0 + $0x112] sm:$0xff] }
  0xc9   :  { %1645 = vmatprep.mubr.f32.mxu1 %v5474_v3 }
  0xcb   :  { %4708 = vmatmul.mubr.msk.f32.gmra.mrb[24].mxu0 %vm88_vm1, %v1072_v34 }
  0xcc   :  { %4746 = vmatmul.mubr.msk.f32.gmra.mrb[24].mxu1 %vm88_vm1, %v1072_v34  ;;  %1370 = vmatprep.mubr.f32.mxu0 %v5474_v3  ;;  %v2257_v34 = vld [vmem:[%s6832_s0 + $0x11a] sm:$0x3f] }
  0xcd   :  { %1651 = vmatprep.mubr.f32.mxu1 %v5474_v3 }
  0xcf   :  { %4709 = vmatmul.mubr.msk.f32.gmra.mrb[26].mxu0 %vm88_vm1, %v1073_v35 }
  0xd0   :  { %4747 = vmatmul.mubr.msk.f32.gmra.mrb[26].mxu1 %vm88_vm1, %v1073_v35  ;;  %1376 = vmatprep.mubr.f32.mxu0 %v5474_v3  ;;  %v3386_v35 = vlaneseq }
  0xd1   :  { %1657 = vmatprep.mubr.f32.mxu1 %v5474_v3 }
  0xd3   :  { %4710 = vmatmul.mubr.msk.f32.gmra.mrb[28].mxu0 %vm88_vm1, %v1074_v36 }
  0xd4   :  { %4748 = vmatmul.mubr.msk.f32.gmra.mrb[28].mxu1 %vm88_vm1, %v1074_v36  ;;  %1382 = vmatprep.mubr.f32.mxu0 %v5474_v3  ;;  %v3387_v36 = vshrl.u32 %v3386_v35, 7 }
  0xd5   :  { %1663 = vmatprep.mubr.f32.mxu1 %v5474_v3 }
  0xd7   :  { %4711 = vmatmul.mubr.msk.f32.gmra.mrb[30].mxu0 %vm88_vm1, %v1075_v37 }
  0xd8   :  { %4749 = vmatmul.mubr.msk.f32.gmra.mrb[30].mxu1 %vm88_vm1, %v1075_v37  ;;  %1388 = vmatprep.mubr.f32.mxu0 %v5474_v3  ;;  %v3388_v37 = vsub.s32 0, %v3387_v36 }
  0xd9   :  { %1669 = vmatprep.mubr.f32.mxu1 %v5474_v3 }
  0xdb   :  { %4712 = vmatmul.mubr.msk.f32.gmra.mrb[32].mxu0 %vm88_vm1, %v1076_v38 }
  0xdc   :  { %4750 = vmatmul.mubr.msk.f32.gmra.mrb[32].mxu1 %vm88_vm1, %v1076_v38  ;;  %1394 = vmatprep.mubr.f32.mxu0 %v5474_v3  ;;  %v3384_v38 = vld [vmem:[%s6835_s4] sm:$0xf] }
  0xdd   :  { %1675 = vmatprep.mubr.f32.mxu1 %v5474_v3 }
  0xdf   :  { %4713 = vmatmul.mubr.msk.f32.gmra.mrb[34].mxu0 %vm88_vm1, %v1077_v39 }
  0xe0   :  { %4751 = vmatmul.mubr.msk.f32.gmra.mrb[34].mxu1 %vm88_vm1, %v1077_v39  ;;  %1400 = vmatprep.mubr.f32.mxu0 %v5474_v3  ;;  %v3396_v39 = vsub.s32 2, %v3387_v36 }
  0xe1   :  { %1681 = vmatprep.mubr.f32.mxu1 %v5474_v3 }
  0xe3   :  { %4714 = vmatmul.mubr.msk.f32.gmra.mrb[36].mxu0 %vm88_vm1, %v1078_v40 }
  0xe4   :  { %4752 = vmatmul.mubr.msk.f32.gmra.mrb[36].mxu1 %vm88_vm1, %v1078_v40  ;;  %1406 = vmatprep.mubr.f32.mxu0 %v5474_v3  ;;  %v3392_v40 = vsub.s32 1, %v3387_v36 }
  0xe5   :  { %1687 = vmatprep.mubr.f32.mxu1 %v5474_v3 }
  0xe7   :  { %4715 = vmatmul.mubr.msk.f32.gmra.mrb[38].mxu0 %vm88_vm1, %v1079_v41 }
  0xe8   :  { %4753 = vmatmul.mubr.msk.f32.gmra.mrb[38].mxu1 %vm88_vm1, %v1079_v41  ;;  %1412 = vmatprep.mubr.f32.mxu0 %v5474_v3  ;;  %v3400_v41 = vsub.s32 3, %v3387_v36 }
  0xe9   :  { %1693 = vmatprep.mubr.f32.mxu1 %v5474_v3 }
  0xeb   :  { %4716 = vmatmul.mubr.msk.f32.gmra.mrb[40].mxu0 %vm88_vm1, %v1080_v42 }
  0xec   :  { %4754 = vmatmul.mubr.msk.f32.gmra.mrb[40].mxu1 %vm88_vm1, %v1080_v42  ;;  %1418 = vmatprep.mubr.f32.mxu0 %v5474_v3 }
  0xed   :  { %1699 = vmatprep.mubr.f32.mxu1 %v5474_v3 }
  0xef   :  { %4717 = vmatmul.mubr.msk.f32.gmra.mrb[42].mxu0 %vm88_vm1, %v1081_v43 }
  0xf0   :  { %4755 = vmatmul.mubr.msk.f32.gmra.mrb[42].mxu1 %vm88_vm1, %v1081_v43  ;;  %1424 = vmatprep.mubr.f32.mxu0 %v5474_v3 }
  0xf1   :  { %1705 = vmatprep.mubr.f32.mxu1 %v5474_v3 }
  0xf3   :  { %4718 = vmatmul.mubr.msk.f32.gmra.mrb[44].mxu0 %vm88_vm1, %v1082_v44 }
  0xf4   :  { %4756 = vmatmul.mubr.msk.f32.gmra.mrb[44].mxu1 %vm88_vm1, %v1082_v44  ;;  %1430 = vmatprep.mubr.f32.mxu0 %v5474_v3 }
  0xf5   :  { %1711 = vmatprep.mubr.f32.mxu1 %v5474_v3 }
  0xf7   :  { %4719 = vmatmul.mubr.msk.f32.gmra.mrb[46].mxu0 %vm88_vm1, %v1083_v45 }
  0xf8   :  { %4757 = vmatmul.mubr.msk.f32.gmra.mrb[46].mxu1 %vm88_vm1, %v1083_v45  ;;  %1436 = vmatprep.mubr.f32.mxu0 %v5474_v3 }
  0xf9   :  { %1717 = vmatprep.mubr.f32.mxu1 %v5474_v3 }
  0xfb   :  { %4720 = vmatmul.mubr.msk.f32.gmra.mrb[48].mxu0 %vm88_vm1, %v1084_v46 }
  0xfc   :  { %4758 = vmatmul.mubr.msk.f32.gmra.mrb[48].mxu1 %vm88_vm1, %v1084_v46  ;;  %1442 = vmatprep.mubr.f32.mxu0 %v5474_v3 }
  0xfd   :  { %1723 = vmatprep.mubr.f32.mxu1 %v5474_v3 }
  0xff   :  { %4721 = vmatmul.mubr.msk.f32.gmra.mrb[50].mxu0 %vm88_vm1, %v1085_v47 }
 0x100   :  { %4759 = vmatmul.mubr.msk.f32.gmra.mrb[50].mxu1 %vm88_vm1, %v1085_v47  ;;  %1448 = vmatprep.mubr.f32.mxu0 %v5474_v3 }
 0x101   :  { %1729 = vmatprep.mubr.f32.mxu1 %v5474_v3 }
 0x103   :  { %4722 = vmatmul.mubr.msk.f32.gmra.mrb[52].mxu0 %vm88_vm1, %v1086_v48 }
 0x104   :  { %4760 = vmatmul.mubr.msk.f32.gmra.mrb[52].mxu1 %vm88_vm1, %v1086_v48  ;;  %1454 = vmatprep.mubr.f32.mxu0 %v5474_v3 }
 0x105   :  { %1735 = vmatprep.mubr.f32.mxu1 %v5474_v3 }
 0x107   :  { %4723 = vmatmul.mubr.msk.f32.gmra.mrb[54].mxu0 %vm88_vm1, %v1087_v49 }
 0x108   :  { %4761 = vmatmul.mubr.msk.f32.gmra.mrb[54].mxu1 %vm88_vm1, %v1087_v49  ;;  %1460 = vmatprep.mubr.f32.mxu0 %v5474_v3  ;;  %v6418_v49 = vrot.slane %v3384_v38, %v3388_v37 }
 0x109   :  { %1741 = vmatprep.mubr.f32.mxu1 %v5474_v3 }
 0x10b   :  { %4724 = vmatmul.mubr.msk.f32.gmra.mrb[56].mxu0 %vm88_vm1, %v1088_v50 }
 0x10c   :  { %4762 = vmatmul.mubr.msk.f32.gmra.mrb[56].mxu1 %vm88_vm1, %v1088_v50  ;;  %1466 = vmatprep.mubr.f32.mxu0 %v5474_v3 }
 0x10d   :  { %1747 = vmatprep.mubr.f32.mxu1 %v5474_v3 }
 0x10f   :  { %4725 = vmatmul.mubr.msk.f32.gmra.mrb[58].mxu0 %vm88_vm1, %v1089_v51 }
 0x110   :  { %4763 = vmatmul.mubr.msk.f32.gmra.mrb[58].mxu1 %vm88_vm1, %v1089_v51  ;;  %1472 = vmatprep.mubr.f32.mxu0 %v5474_v3 }
 0x111   :  { %1753 = vmatprep.mubr.f32.mxu1 %v5474_v3 }
 0x113   :  { %4726 = vmatmul.mubr.msk.f32.gmra.mrb[60].mxu0 %vm88_vm1, %v1090_v52 }
 0x114   :  { %4764 = vmatmul.mubr.msk.f32.gmra.mrb[60].mxu1 %vm88_vm1, %v1090_v52  ;;  %1478 = vmatprep.mubr.f32.mxu0 %v5474_v3 }
 0x115   :  { %1759 = vmatprep.mubr.f32.mxu1 %v5474_v3 }
 0x117   :  { %4727 = vmatmul.mubr.msk.f32.gmra.mrb[62].mxu0 %vm88_vm1, %v1091_v53 }
 0x118   :  { %4765 = vmatmul.mubr.msk.f32.gmra.mrb[62].mxu1 %vm88_vm1, %v1091_v53  ;;  %1484 = vmatprep.mubr.f32.mxu0 %v5474_v3 }
 0x119   :  { %1765 = vmatprep.mubr.f32.mxu1 %v5474_v3 }
 0x11b   :  { %4728 = vmatmul.mubr.msk.f32.gmra.mrb[64].mxu0 %vm88_vm1, %v1092_v54 }
 0x11c   :  { %4766 = vmatmul.mubr.msk.f32.gmra.mrb[64].mxu1 %vm88_vm1, %v1092_v54  ;;  %1490 = vmatprep.mubr.f32.mxu0 %v5474_v3  ;;  %v6420_v54 = vrot.slane %v3384_v38, %v3396_v39 }
 0x11d   :  { %1771 = vmatprep.mubr.f32.mxu1 %v5474_v3 }
 0x11f   :  { %4729 = vmatmul.mubr.msk.f32.gmra.mrb[66].mxu0 %vm88_vm1, %v1093_v55 }
 0x120   :  { %4767 = vmatmul.mubr.msk.f32.gmra.mrb[66].mxu1 %vm88_vm1, %v1093_v55  ;;  %1496 = vmatprep.mubr.f32.mxu0 %v5474_v3  ;;  %v6422_v55 = vrot.slane %v3384_v38, %v3392_v40 }
 0x121   :  { %1777 = vmatprep.mubr.f32.mxu1 %v5474_v3 }
 0x123   :  { %4730 = vmatmul.mubr.msk.f32.gmra.mrb[68].mxu0 %vm88_vm1, %v1094_v56 }
 0x124   :  { %4768 = vmatmul.mubr.msk.f32.gmra.mrb[68].mxu1 %vm88_vm1, %v1094_v56  ;;  %1502 = vmatprep.mubr.f32.mxu0 %v5474_v3 }
 0x125   :  { %1783 = vmatprep.mubr.f32.mxu1 %v5474_v3 }
 0x127   :  { %4731 = vmatmul.mubr.msk.f32.gmra.mrb[72].mxu0 %vm88_vm1, %v1095_v57 }
 0x128   :  { %4769 = vmatmul.mubr.msk.f32.gmra.mrb[72].mxu1 %vm88_vm1, %v1095_v57  ;;  %2454 = vmatprep.mubr.f32.mxu0 %v5474_v3  ;;  %v6424_v57 = vrot.slane %v3384_v38, %v3400_v41 }
 0x129   :  { %2735 = vmatprep.mubr.f32.mxu1 %v5474_v3 }
 0x12b   :  { %4772 = vmatmul.mubr.msk.f32.vlgmr.msra.gmra.mrb[0].mxu0 %vm88_vm1, %v2222_v58 }
 0x12c   :  { %4810 = vmatmul.mubr.msk.f32.vlgmr.msra.gmra.mrb[0].mxu1 %vm88_vm1, %v2222_v58  ;;  %2460 = vmatprep.mubr.f32.mxu0 %v5474_v3 }
 0x12d   :  { %2741 = vmatprep.mubr.f32.mxu1 %v5474_v3 }
 0x12f   :  { %4773 = vmatmul.mubr.msk.f32.gmra.mrb[2].mxu0 %vm88_vm1, %v2223_v59 }
 0x130   :  { %4811 = vmatmul.mubr.msk.f32.gmra.mrb[2].mxu1 %vm88_vm1, %v2223_v59  ;;  %2466 = vmatprep.mubr.f32.mxu0 %v5474_v3 }
 0x131   :  { %2747 = vmatprep.mubr.f32.mxu1 %v5474_v3 }
 0x133   :  { %4774 = vmatmul.mubr.msk.f32.gmra.mrb[4].mxu0 %vm88_vm1, %v2224_v60 }
 0x134   :  { %4812 = vmatmul.mubr.msk.f32.gmra.mrb[4].mxu1 %vm88_vm1, %v2224_v60  ;;  %2472 = vmatprep.mubr.f32.mxu0 %v5474_v3 }
 0x135   :  { %2753 = vmatprep.mubr.f32.mxu1 %v5474_v3 }
 0x137   :  { %4775 = vmatmul.mubr.msk.f32.gmra.mrb[6].mxu0 %vm88_vm1, %v2225_v61 }
 0x138   :  { %4813 = vmatmul.mubr.msk.f32.gmra.mrb[6].mxu1 %vm88_vm1, %v2225_v61  ;;  %2478 = vmatprep.mubr.f32.mxu0 %v5474_v3 }
 0x139   :  { %2759 = vmatprep.mubr.f32.mxu1 %v5474_v3 }
 0x13b   :  { %4776 = vmatmul.mubr.msk.f32.gmra.mrb[8].mxu0 %vm88_vm1, %v2226_v62 }
 0x13c   :  { %4814 = vmatmul.mubr.msk.f32.gmra.mrb[8].mxu1 %vm88_vm1, %v2226_v62  ;;  %2484 = vmatprep.mubr.f32.mxu0 %v5474_v3 }
 0x13d   :  { %2765 = vmatprep.mubr.f32.mxu1 %v5474_v3 }
 0x13f   :  { %4777 = vmatmul.mubr.msk.f32.gmra.mrb[10].mxu0 %vm88_vm1, %v2227_v63 }
 0x140   :  { %4815 = vmatmul.mubr.msk.f32.gmra.mrb[10].mxu1 %vm88_vm1, %v2227_v63  ;;  %2490 = vmatprep.mubr.f32.mxu0 %v5474_v3 }
 0x141   :  { %2771 = vmatprep.mubr.f32.mxu1 %v5474_v3 }
 0x143   :  { %4778 = vmatmul.mubr.msk.f32.gmra.mrb[12].mxu0 %vm88_vm1, %v2228_v0 }
 0x144   :  { %4816 = vmatmul.mubr.msk.f32.gmra.mrb[12].mxu1 %vm88_vm1, %v2228_v0  ;;  %2496 = vmatprep.mubr.f32.mxu0 %v5474_v3 }
 0x145   :  { %2777 = vmatprep.mubr.f32.mxu1 %v5474_v3 }
 0x147   :  { %4779 = vmatmul.mubr.msk.f32.gmra.mrb[14].mxu0 %vm88_vm1, %v2229_v1 }
 0x148   :  { %4817 = vmatmul.mubr.msk.f32.gmra.mrb[14].mxu1 %vm88_vm1, %v2229_v1  ;;  %2502 = vmatprep.mubr.f32.mxu0 %v5474_v3 }
 0x149   :  { %2783 = vmatprep.mubr.f32.mxu1 %v5474_v3 }
 0x14b   :  { %4780 = vmatmul.mubr.msk.f32.gmra.mrb[16].mxu0 %vm88_vm1, %v2230_v2 }
 0x14c   :  { %4818 = vmatmul.mubr.msk.f32.gmra.mrb[16].mxu1 %vm88_vm1, %v2230_v2  ;;  %2508 = vmatprep.mubr.f32.mxu0 %v5474_v3 }
 0x14d   :  { %2789 = vmatprep.mubr.f32.mxu1 %v5474_v3 }
 0x14f   :  { %4781 = vmatmul.mubr.msk.f32.gmra.mrb[18].mxu0 %vm88_vm1, %v2231_v4 }
 0x150   :  { %4819 = vmatmul.mubr.msk.f32.gmra.mrb[18].mxu1 %vm88_vm1, %v2231_v4  ;;  %2514 = vmatprep.mubr.f32.mxu0 %v5474_v3  ;;  %v5475_v4 = vmov 1983009808  }
 0x151   :  { %2795 = vmatprep.mubr.f32.mxu1 %v5474_v3 }
 0x153   :  { %4782 = vmatmul.mubr.msk.f32.gmra.mrb[20].mxu0 %vm88_vm1, %v2232_v5 }
 0x154   :  { %4820 = vmatmul.mubr.msk.f32.gmra.mrb[20].mxu1 %vm88_vm1, %v2232_v5  ;;  %2520 = vmatprep.mubr.f32.mxu0 %v5474_v3  ;;  %v3986_v5 = vunpack.c.l.s4 %v5475_v4 }
 0x155   :  { %2801 = vmatprep.mubr.f32.mxu1 %v5474_v3 }
 0x157   :  { %4783 = vmatmul.mubr.msk.f32.gmra.mrb[22].mxu0 %vm88_vm1, %v2233_v6 }
 0x158   :  { %4821 = vmatmul.mubr.msk.f32.gmra.mrb[22].mxu1 %vm88_vm1, %v2233_v6  ;;  %2526 = vmatprep.mubr.f32.mxu0 %v5474_v3 }
 0x159   :  { %2807 = vmatprep.mubr.f32.mxu1 %v5474_v3 }
 0x15b   :  { %4784 = vmatmul.mubr.msk.f32.gmra.mrb[24].mxu0 %vm88_vm1, %v2234_v7 }
 0x15c   :  { %4822 = vmatmul.mubr.msk.f32.gmra.mrb[24].mxu1 %vm88_vm1, %v2234_v7  ;;  %2532 = vmatprep.mubr.f32.mxu0 %v5474_v3 }
 0x15d   :  { %2813 = vmatprep.mubr.f32.mxu1 %v5474_v3 }
 0x15f   :  { %4785 = vmatmul.mubr.msk.f32.gmra.mrb[26].mxu0 %vm88_vm1, %v2235_v8 }
 0x160   :  { %4823 = vmatmul.mubr.msk.f32.gmra.mrb[26].mxu1 %vm88_vm1, %v2235_v8  ;;  %2538 = vmatprep.mubr.f32.mxu0 %v5474_v3 }
 0x161   :  { %2819 = vmatprep.mubr.f32.mxu1 %v5474_v3 }
 0x163   :  { %4786 = vmatmul.mubr.msk.f32.gmra.mrb[28].mxu0 %vm88_vm1, %v2236_v9 }
 0x164   :  { %4824 = vmatmul.mubr.msk.f32.gmra.mrb[28].mxu1 %vm88_vm1, %v2236_v9  ;;  %2544 = vmatprep.mubr.f32.mxu0 %v5474_v3 }
 0x165   :  { %2825 = vmatprep.mubr.f32.mxu1 %v5474_v3 }
 0x167   :  { %4787 = vmatmul.mubr.msk.f32.gmra.mrb[30].mxu0 %vm88_vm1, %v2237_v10 }
 0x168   :  { %4825 = vmatmul.mubr.msk.f32.gmra.mrb[30].mxu1 %vm88_vm1, %v2237_v10  ;;  %2550 = vmatprep.mubr.f32.mxu0 %v5474_v3 }
 0x169   :  { %2831 = vmatprep.mubr.f32.mxu1 %v5474_v3 }
 0x16a   :  { %v486_v12 = vpop.f32.mrb[70].mxu0 }
 0x16b   :  { %912 = vst [vmem:[#allocation2 + $0x460] sm:$0x3f] %v486_v12  ;;  %v767_v13 = vpop.f32.mrb[70].mxu1  ;;  %v488_v14 = vpop.f32.mrb[71].mxu0  ;;  %4788 = vmatmul.mubr.msk.f32.gmra.mrb[32].mxu0 %vm88_vm1, %v2238_v11 }
 0x16c   :  { %914 = vst [vmem:[#allocation2 + $0x470] sm:$0x3f] %v767_v13  ;;  %913 = vst [vmem:[#allocation2 + $0x468] sm:$0x3f] %v488_v14  ;;  %v769_v15 = vpop.f32.mrb[71].mxu1  ;;  %4826 = vmatmul.mubr.msk.f32.gmra.mrb[32].mxu1 %vm88_vm1, %v2238_v11  ;;  %2556 = vmatprep.mubr.f32.mxu0 %v5474_v3  ;;  %v3987_v13 = vunpack.c.0.s8 %v3986_v5 }
 0x16d   :  { %915 = vst [vmem:[#allocation2 + $0x478] sm:$0x3f] %v769_v15  ;;  %2837 = vmatprep.mubr.f32.mxu1 %v5474_v3 }
 0x16f   :  { %4789 = vmatmul.mubr.msk.f32.gmra.mrb[34].mxu0 %vm88_vm1, %v2239_v16 }
 0x170   :  { %4827 = vmatmul.mubr.msk.f32.gmra.mrb[34].mxu1 %vm88_vm1, %v2239_v16  ;;  %2562 = vmatprep.mubr.f32.mxu0 %v5474_v3 }
 0x171   :  { %2843 = vmatprep.mubr.f32.mxu1 %v5474_v3 }
 0x172   :  { %v1056_v42 = vld [vmem:[#allocation2 + $0x460] sm:$0x3f] }
 0x173   :  { %4790 = vmatmul.mubr.msk.f32.gmra.mrb[36].mxu0 %vm88_vm1, %v2240_v17  ;;  %v1058_v45 = vld [vmem:[#allocation2 + $0x470] sm:$0x3f]  ;;  %v1057_v47 = vld [vmem:[#allocation2 + $0x468] sm:$0x3f] }
 0x174   :  { %4828 = vmatmul.mubr.msk.f32.gmra.mrb[36].mxu1 %vm88_vm1, %v2240_v17  ;;  %2568 = vmatprep.mubr.f32.mxu0 %v5474_v3  ;;  %v1059_v52 = vld [vmem:[#allocation2 + $0x478] sm:$0x3f] }
 0x175   :  { %2849 = vmatprep.mubr.f32.mxu1 %v5474_v3 }
 0x177   :  { %4791 = vmatmul.mubr.msk.f32.gmra.mrb[38].mxu0 %vm88_vm1, %v2241_v18 }
 0x178   :  { %4829 = vmatmul.mubr.msk.f32.gmra.mrb[38].mxu1 %vm88_vm1, %v2241_v18  ;;  %2574 = vmatprep.mubr.f32.mxu0 %v5474_v3 }
 0x179   :  { %2855 = vmatprep.mubr.f32.mxu1 %v5474_v3 }
 0x17b   :  { %4792 = vmatmul.mubr.msk.f32.gmra.mrb[40].mxu0 %vm88_vm1, %v2242_v19 }
 0x17c   :  { %4830 = vmatmul.mubr.msk.f32.gmra.mrb[40].mxu1 %vm88_vm1, %v2242_v19  ;;  %2580 = vmatprep.mubr.f32.mxu0 %v5474_v3  ;;  %v6434_v19 = vsub.s32 %v3987_v13, %v3387_v36 }
 0x17d   :  { %2861 = vmatprep.mubr.f32.mxu1 %v5474_v3 }
 0x17f   :  { %4793 = vmatmul.mubr.msk.f32.gmra.mrb[42].mxu0 %vm88_vm1, %v2243_v20 }
 0x180   :  { %4831 = vmatmul.mubr.msk.f32.gmra.mrb[42].mxu1 %vm88_vm1, %v2243_v20  ;;  %2586 = vmatprep.mubr.f32.mxu0 %v5474_v3 }
 0x181   :  { %2867 = vmatprep.mubr.f32.mxu1 %v5474_v3 }
 0x183   :  { %4794 = vmatmul.mubr.msk.f32.gmra.mrb[44].mxu0 %vm88_vm1, %v2244_v21 }
 0x184   :  { %4832 = vmatmul.mubr.msk.f32.gmra.mrb[44].mxu1 %vm88_vm1, %v2244_v21  ;;  %2592 = vmatprep.mubr.f32.mxu0 %v5474_v3 }
 0x185   :  { %2873 = vmatprep.mubr.f32.mxu1 %v5474_v3 }
 0x187   :  { %4795 = vmatmul.mubr.msk.f32.gmra.mrb[46].mxu0 %vm88_vm1, %v2245_v22 }
 0x188   :  { %4833 = vmatmul.mubr.msk.f32.gmra.mrb[46].mxu1 %vm88_vm1, %v2245_v22  ;;  %2598 = vmatprep.mubr.f32.mxu0 %v5474_v3 }
 0x189   :  { %2879 = vmatprep.mubr.f32.mxu1 %v5474_v3 }
 0x18b   :  { %4796 = vmatmul.mubr.msk.f32.gmra.mrb[48].mxu0 %vm88_vm1, %v2246_v23 }
 0x18c   :  { %4834 = vmatmul.mubr.msk.f32.gmra.mrb[48].mxu1 %vm88_vm1, %v2246_v23  ;;  %2604 = vmatprep.mubr.f32.mxu0 %v5474_v3 }
 0x18d   :  { %2885 = vmatprep.mubr.f32.mxu1 %v5474_v3 }
 0x18f   :  { %4797 = vmatmul.mubr.msk.f32.gmra.mrb[50].mxu0 %vm88_vm1, %v2247_v24 }
 0x190   :  { %4835 = vmatmul.mubr.msk.f32.gmra.mrb[50].mxu1 %vm88_vm1, %v2247_v24  ;;  %2610 = vmatprep.mubr.f32.mxu0 %v5474_v3 }
 0x191   :  { %2891 = vmatprep.mubr.f32.mxu1 %v5474_v3 }
 0x193   :  { %4798 = vmatmul.mubr.msk.f32.gmra.mrb[52].mxu0 %vm88_vm1, %v2248_v25 }
 0x194   :  { %4836 = vmatmul.mubr.msk.f32.gmra.mrb[52].mxu1 %vm88_vm1, %v2248_v25  ;;  %2616 = vmatprep.mubr.f32.mxu0 %v5474_v3 }
 0x195   :  { %2897 = vmatprep.mubr.f32.mxu1 %v5474_v3 }
 0x197   :  { %4799 = vmatmul.mubr.msk.f32.gmra.mrb[54].mxu0 %vm88_vm1, %v2249_v26 }
 0x198   :  { %4837 = vmatmul.mubr.msk.f32.gmra.mrb[54].mxu1 %vm88_vm1, %v2249_v26  ;;  %2622 = vmatprep.mubr.f32.mxu0 %v5474_v3 }
 0x199   :  { %2903 = vmatprep.mubr.f32.mxu1 %v5474_v3 }
 0x19b   :  { %4800 = vmatmul.mubr.msk.f32.gmra.mrb[56].mxu0 %vm88_vm1, %v2250_v27 }
 0x19c   :  { %4838 = vmatmul.mubr.msk.f32.gmra.mrb[56].mxu1 %vm88_vm1, %v2250_v27  ;;  %2628 = vmatprep.mubr.f32.mxu0 %v5474_v3 }
 0x19d   :  { %2909 = vmatprep.mubr.f32.mxu1 %v5474_v3 }
 0x19f   :  { %4801 = vmatmul.mubr.msk.f32.gmra.mrb[58].mxu0 %vm88_vm1, %v2251_v28 }
 0x1a0   :  { %4839 = vmatmul.mubr.msk.f32.gmra.mrb[58].mxu1 %vm88_vm1, %v2251_v28  ;;  %2634 = vmatprep.mubr.f32.mxu0 %v5474_v3  ;;  %v6440_v28 = vld [vmem:[%s6836_s5] sm:$0x3f] }
 0x1a1   :  { %2915 = vmatprep.mubr.f32.mxu1 %v5474_v3  ;;  %v6447_v37 = vrot.slane %v6440_v28, %v6434_v19 }
 0x1a3   :  { %4802 = vmatmul.mubr.msk.f32.gmra.mrb[60].mxu0 %vm88_vm1, %v2252_v29 }
 0x1a4   :  { %4840 = vmatmul.mubr.msk.f32.gmra.mrb[60].mxu1 %vm88_vm1, %v2252_v29  ;;  %2640 = vmatprep.mubr.f32.mxu0 %v5474_v3 }
 0x1a5   :  { %2921 = vmatprep.mubr.f32.mxu1 %v5474_v3 }
 0x1a7   :  { %4803 = vmatmul.mubr.msk.f32.gmra.mrb[62].mxu0 %vm88_vm1, %v2253_v30 }
 0x1a8   :  { %4841 = vmatmul.mubr.msk.f32.gmra.mrb[62].mxu1 %vm88_vm1, %v2253_v30  ;;  %2646 = vmatprep.mubr.f32.mxu0 %v5474_v3 }
 0x1a9   :  { %2927 = vmatprep.mubr.f32.mxu1 %v5474_v3 }
 0x1ab   :  { %4804 = vmatmul.mubr.msk.f32.gmra.mrb[64].mxu0 %vm88_vm1, %v2254_v31 }
 0x1ac   :  { %4842 = vmatmul.mubr.msk.f32.gmra.mrb[64].mxu1 %vm88_vm1, %v2254_v31  ;;  %2652 = vmatprep.mubr.f32.mxu0 %v5474_v3 }
 0x1ad   :  { %2933 = vmatprep.mubr.f32.mxu1 %v5474_v3 }
 0x1af   :  { %4805 = vmatmul.mubr.msk.f32.gmra.mrb[66].mxu0 %vm88_vm1, %v2255_v32 }
 0x1b0   :  { %4843 = vmatmul.mubr.msk.f32.gmra.mrb[66].mxu1 %vm88_vm1, %v2255_v32  ;;  %2658 = vmatprep.mubr.f32.mxu0 %v5474_v3 }
 0x1b1   :  { %2939 = vmatprep.mubr.f32.mxu1 %v5474_v3 }
 0x1b3   :  { %4806 = vmatmul.mubr.msk.f32.gmra.mrb[68].mxu0 %vm88_vm1, %v2256_v33 }
 0x1b4   :  { %4844 = vmatmul.mubr.msk.f32.gmra.mrb[68].mxu1 %vm88_vm1, %v2256_v33  ;;  %2664 = vmatprep.mubr.f32.mxu0 %v5474_v3 }
 0x1b5   :  { %2945 = vmatprep.mubr.f32.mxu1 %v5474_v3 }
 0x1b7   :  { %4807 = vmatmul.mubr.msk.f32.gmra.mrb[74].mxu0 %vm88_vm1, %v2257_v34 }
 0x1b8   :  { %4845 = vmatmul.mubr.msk.f32.gmra.mrb[74].mxu1 %vm88_vm1, %v2257_v34 }
 0x1fa   :  { %v1504_v43 = vpop.f32.mrb[72].mxu0 }
 0x1fb   :  { %v1930_v44 = vadd.f32 %v1504_v43, %v1056_v42  ;;  %v1785_v46 = vpop.f32.mrb[72].mxu1  ;;  %v1506_v48 = vpop.f32.mrb[73].mxu0 }
 0x1fc   :  { %v1932_v50 = vadd.f32 %v1785_v46, %v1058_v45  ;;  %v1931_v51 = vadd.f32 %v1506_v48, %v1057_v47  ;;  %v1787_v53 = vpop.f32.mrb[73].mxu1  ;;  %v3999_v45 = vcombine.high %v6447_v37, %v6447_v37 }
 0x1fd   :  { %2074 = vst [vmem:[#allocation2 + $0x460] sm:$0x3f] %v1930_v44  ;;  %v1933_v56 = vadd.f32 %v1787_v53, %v1059_v52 }
 0x1fe   :  { %2076 = vst [vmem:[#allocation2 + $0x470] sm:$0x3f] %v1932_v50  ;;  %2075 = vst [vmem:[#allocation2 + $0x468] sm:$0x3f] %v1931_v51  ;;  %v2456_v58 = vpop.f32.mrb[0].mxu0  ;;  %4082 = vmatprep.mubr.f32.mxu0 %v3999_v45  ;;  %4224 = vmatprep.mubr.f32.mxu1 %v3999_v45 }
 0x1ff   :  { %2077 = vst [vmem:[#allocation2 + $0x478] sm:$0x3f] %v1933_v56  ;;  %v3406_v59 = vadd.f32 %v6418_v49, %v2456_v58  ;;  %v2737_v60 = vpop.f32.mrb[0].mxu1  ;;  %v2458_v61 = vpop.f32.mrb[1].mxu0 }
 0x200   :  { %v3408_v62 = vadd.f32 %v6420_v54, %v2737_v60  ;;  %v3407_v63 = vadd.f32 %v6422_v55, %v2458_v61  ;;  %v2739_v0 = vpop.f32.mrb[1].mxu1 }
 0x201   :  { %v3550_v1 = vmax.f32 %v3406_v59, 0.0  ;;  %v3409_v2 = vadd.f32 %v6424_v57, %v2739_v0 }
 0x202   :  { %v3552_v6 = vmax.f32 %v3408_v62, 0.0  ;;  %v3551_v7 = vmax.f32 %v3407_v63, 0.0  ;;  %v2462_v8 = vpop.f32.mrb[2].mxu0 }
 0x203   :  { %v3553_v9 = vmax.f32 %v3409_v2, 0.0  ;;  %v3410_v10 = vadd.f32 %v6418_v49, %v2462_v8  ;;  %v2743_v11 = vpop.f32.mrb[2].mxu1  ;;  %v2464_v12 = vpop.f32.mrb[3].mxu0 }
 0x204   :  { %v3412_v14 = vadd.f32 %v6420_v54, %v2743_v11  ;;  %v3411_v15 = vadd.f32 %v6422_v55, %v2464_v12  ;;  %v2745_v16 = vpop.f32.mrb[3].mxu1 }
 0x205   :  { %v3554_v17 = vmax.f32 %v3410_v10, 0.0  ;;  %v3413_v18 = vadd.f32 %v6424_v57, %v2745_v16 }
 0x206   :  { %v3556_v20 = vmax.f32 %v3412_v14, 0.0  ;;  %v3555_v21 = vmax.f32 %v3411_v15, 0.0  ;;  %v2468_v22 = vpop.f32.mrb[4].mxu0 }
 0x207   :  { %v3557_v23 = vmax.f32 %v3413_v18, 0.0  ;;  %v3414_v24 = vadd.f32 %v6418_v49, %v2468_v22  ;;  %v2749_v25 = vpop.f32.mrb[4].mxu1  ;;  %v2470_v26 = vpop.f32.mrb[5].mxu0  ;;  %v4968_v27 = vpack.c.bf16 %v3554_v17, %v3550_v1 }
 0x208   :  { %v3416_v29 = vadd.f32 %v6420_v54, %v2749_v25  ;;  %v3415_v30 = vadd.f32 %v6422_v55, %v2470_v26  ;;  %v2751_v31 = vpop.f32.mrb[5].mxu1  ;;  %v4966_v32 = vpack.c.bf16 %v3555_v21, %v3551_v7  ;;  %v5042_v33 = vpack.c.bf16 %v3556_v20, %v3552_v6 }
 0x209   :  { %v3558_v34 = vmax.f32 %v3414_v24, 0.0  ;;  %v3417_v35 = vadd.f32 %v6424_v57, %v2751_v31  ;;  %v5040_v36 = vpack.c.bf16 %v3557_v23, %v3553_v9 }
 0x20a   :  { %v3560_v38 = vmax.f32 %v3416_v29, 0.0  ;;  %v3559_v39 = vmax.f32 %v3415_v30, 0.0  ;;  %v2474_v40 = vpop.f32.mrb[6].mxu0  ;;  %4967 = vmatprep.subr.bf16.mxu0 %v4966_v32 }
 0x20b   :  { %v3561_v41 = vmax.f32 %v3417_v35, 0.0  ;;  %v3418_v42 = vadd.f32 %v6418_v49, %v2474_v40  ;;  %v2755_v43 = vpop.f32.mrb[6].mxu1  ;;  %v2476_v44 = vpop.f32.mrb[7].mxu0  ;;  %5041 = vmatprep.subr.bf16.mxu1 %v5040_v36  ;;  %4969 = vmatpush1.bf16.msra.mxu0 %v4968_v27 }
 0x20c   :  { %v3420_v46 = vadd.f32 %v6420_v54, %v2755_v43  ;;  %v3419_v47 = vadd.f32 %v6422_v55, %v2476_v44  ;;  %v2757_v48 = vpop.f32.mrb[7].mxu1  ;;  %5043 = vmatpush1.bf16.msra.mxu1 %v5042_v33 }
 0x20d   :  { %v3562_v50 = vmax.f32 %v3418_v42, 0.0  ;;  %v3421_v51 = vadd.f32 %v6424_v57, %v2757_v48 }
 0x20e   :  { %v3564_v52 = vmax.f32 %v3420_v46, 0.0  ;;  %v3563_v53 = vmax.f32 %v3419_v47, 0.0  ;;  %v2480_v56 = vpop.f32.mrb[8].mxu0 }
 0x20f   :  { %v3565_v58 = vmax.f32 %v3421_v51, 0.0  ;;  %v3422_v59 = vadd.f32 %v6418_v49, %v2480_v56  ;;  %v2761_v60 = vpop.f32.mrb[8].mxu1  ;;  %v2482_v61 = vpop.f32.mrb[9].mxu0  ;;  %v4972_v62 = vpack.c.bf16 %v3562_v50, %v3558_v34 }
 0x210   :  { %v3424_v63 = vadd.f32 %v6420_v54, %v2761_v60  ;;  %v3423_v0 = vadd.f32 %v6422_v55, %v2482_v61  ;;  %v2763_v1 = vpop.f32.mrb[9].mxu1  ;;  %v4970_v2 = vpack.c.bf16 %v3563_v53, %v3559_v39  ;;  %v5046_v4 = vpack.c.bf16 %v3564_v52, %v3560_v38 }
 0x211   :  { %v3566_v5 = vmax.f32 %v3422_v59, 0.0  ;;  %v3425_v6 = vadd.f32 %v6424_v57, %v2763_v1  ;;  %v5044_v7 = vpack.c.bf16 %v3565_v58, %v3561_v41 }
 0x212   :  { %v3568_v8 = vmax.f32 %v3424_v63, 0.0  ;;  %v3567_v9 = vmax.f32 %v3423_v0, 0.0  ;;  %v2486_v10 = vpop.f32.mrb[10].mxu0  ;;  %4971 = vmatprep.subr.bf16.mxu0 %v4970_v2 }
 0x213   :  { %v3569_v11 = vmax.f32 %v3425_v6, 0.0  ;;  %v3426_v12 = vadd.f32 %v6418_v49, %v2486_v10  ;;  %v2767_v13 = vpop.f32.mrb[10].mxu1  ;;  %v2488_v14 = vpop.f32.mrb[11].mxu0  ;;  %5045 = vmatprep.subr.bf16.mxu1 %v5044_v7  ;;  %4973 = vmatpush1.bf16.msra.mxu0 %v4972_v62 }
 0x214   :  { %v3428_v15 = vadd.f32 %v6420_v54, %v2767_v13  ;;  %v3427_v16 = vadd.f32 %v6422_v55, %v2488_v14  ;;  %v2769_v17 = vpop.f32.mrb[11].mxu1  ;;  %5047 = vmatpush1.bf16.msra.mxu1 %v5046_v4 }
 0x215   :  { %v3570_v18 = vmax.f32 %v3426_v12, 0.0  ;;  %v3429_v20 = vadd.f32 %v6424_v57, %v2769_v17 }
 0x216   :  { %v3572_v21 = vmax.f32 %v3428_v15, 0.0  ;;  %v3571_v22 = vmax.f32 %v3427_v16, 0.0  ;;  %v2492_v23 = vpop.f32.mrb[12].mxu0 }
 0x217   :  { %v3573_v24 = vmax.f32 %v3429_v20, 0.0  ;;  %v3430_v25 = vadd.f32 %v6418_v49, %v2492_v23  ;;  %v2773_v26 = vpop.f32.mrb[12].mxu1  ;;  %v2494_v27 = vpop.f32.mrb[13].mxu0  ;;  %v4976_v29 = vpack.c.bf16 %v3570_v18, %v3566_v5 }
 0x218   :  { %v3432_v30 = vadd.f32 %v6420_v54, %v2773_v26  ;;  %v3431_v31 = vadd.f32 %v6422_v55, %v2494_v27  ;;  %v2775_v32 = vpop.f32.mrb[13].mxu1  ;;  %v4974_v33 = vpack.c.bf16 %v3571_v22, %v3567_v9  ;;  %v5050_v34 = vpack.c.bf16 %v3572_v21, %v3568_v8 }
 0x219   :  { %v3574_v35 = vmax.f32 %v3430_v25, 0.0  ;;  %v3433_v36 = vadd.f32 %v6424_v57, %v2775_v32  ;;  %v5048_v38 = vpack.c.bf16 %v3573_v24, %v3569_v11  ;;  %v3984_v11 = vcombine.high %v6440_v28, %v6440_v28 }
 0x21a   :  { %v3576_v39 = vmax.f32 %v3432_v30, 0.0  ;;  %v3575_v40 = vmax.f32 %v3431_v31, 0.0  ;;  %v2498_v41 = vpop.f32.mrb[14].mxu0  ;;  %4975 = vmatprep.subr.bf16.mxu0 %v4974_v33 }
 0x21b   :  { %v3577_v42 = vmax.f32 %v3433_v36, 0.0  ;;  %v3434_v43 = vadd.f32 %v6418_v49, %v2498_v41  ;;  %v2779_v44 = vpop.f32.mrb[14].mxu1  ;;  %v2500_v45 = vpop.f32.mrb[15].mxu0  ;;  %5049 = vmatprep.subr.bf16.mxu1 %v5048_v38  ;;  %4977 = vmatpush1.bf16.msra.mxu0 %v4976_v29  ;;  %v6482_v28 = vrot.slane %v3984_v11, %v6434_v19 }
 0x21c   :  { %v3436_v46 = vadd.f32 %v6420_v54, %v2779_v44  ;;  %v3435_v47 = vadd.f32 %v6422_v55, %v2500_v45  ;;  %v2781_v48 = vpop.f32.mrb[15].mxu1  ;;  %5051 = vmatpush1.bf16.msra.mxu1 %v5050_v34 }
 0x21d   :  { %v3578_v50 = vmax.f32 %v3434_v43, 0.0  ;;  %v3437_v51 = vadd.f32 %v6424_v57, %v2781_v48 }
 0x21e   :  { %v3580_v52 = vmax.f32 %v3436_v46, 0.0  ;;  %v3579_v53 = vmax.f32 %v3435_v47, 0.0  ;;  %v2504_v56 = vpop.f32.mrb[16].mxu0 }
 0x21f   :  { %v3581_v58 = vmax.f32 %v3437_v51, 0.0  ;;  %v3438_v59 = vadd.f32 %v6418_v49, %v2504_v56  ;;  %v2785_v60 = vpop.f32.mrb[16].mxu1  ;;  %v2506_v61 = vpop.f32.mrb[17].mxu0  ;;  %v4980_v62 = vpack.c.bf16 %v3578_v50, %v3574_v35 }
 0x220   :  { %v3440_v63 = vadd.f32 %v6420_v54, %v2785_v60  ;;  %v3439_v0 = vadd.f32 %v6422_v55, %v2506_v61  ;;  %v2787_v1 = vpop.f32.mrb[17].mxu1  ;;  %v4978_v2 = vpack.c.bf16 %v3579_v53, %v3575_v40  ;;  %v5054_v4 = vpack.c.bf16 %v3580_v52, %v3576_v39 }
 0x221   :  { %v3582_v5 = vmax.f32 %v3438_v59, 0.0  ;;  %v3441_v6 = vadd.f32 %v6424_v57, %v2787_v1  ;;  %v5052_v7 = vpack.c.bf16 %v3581_v58, %v3577_v42 }
 0x222   :  { %v3584_v8 = vmax.f32 %v3440_v63, 0.0  ;;  %v3583_v9 = vmax.f32 %v3439_v0, 0.0  ;;  %v2510_v10 = vpop.f32.mrb[18].mxu0  ;;  %4979 = vmatprep.subr.bf16.mxu0 %v4978_v2 }
 0x223   :  { %v3585_v12 = vmax.f32 %v3441_v6, 0.0  ;;  %v3442_v13 = vadd.f32 %v6418_v49, %v2510_v10  ;;  %v2791_v14 = vpop.f32.mrb[18].mxu1  ;;  %v2512_v15 = vpop.f32.mrb[19].mxu0  ;;  %5053 = vmatprep.subr.bf16.mxu1 %v5052_v7  ;;  %4981 = vmatpush1.bf16.msra.mxu0 %v4980_v62 }
 0x224   :  { %v3444_v16 = vadd.f32 %v6420_v54, %v2791_v14  ;;  %v3443_v17 = vadd.f32 %v6422_v55, %v2512_v15  ;;  %v2793_v18 = vpop.f32.mrb[19].mxu1  ;;  %5055 = vmatpush1.bf16.msra.mxu1 %v5054_v4 }
 0x225   :  { %v3586_v20 = vmax.f32 %v3442_v13, 0.0  ;;  %v3445_v21 = vadd.f32 %v6424_v57, %v2793_v18 }
 0x226   :  { %v3588_v22 = vmax.f32 %v3444_v16, 0.0  ;;  %v3587_v23 = vmax.f32 %v3443_v17, 0.0  ;;  %v2516_v24 = vpop.f32.mrb[20].mxu0 }
 0x227   :  { %v3589_v25 = vmax.f32 %v3445_v21, 0.0  ;;  %v3446_v26 = vadd.f32 %v6418_v49, %v2516_v24  ;;  %v2797_v27 = vpop.f32.mrb[20].mxu1  ;;  %v2518_v29 = vpop.f32.mrb[21].mxu0  ;;  %v4984_v30 = vpack.c.bf16 %v3586_v20, %v3582_v5 }
 0x228   :  { %v3448_v31 = vadd.f32 %v6420_v54, %v2797_v27  ;;  %v3447_v32 = vadd.f32 %v6422_v55, %v2518_v29  ;;  %v2799_v33 = vpop.f32.mrb[21].mxu1  ;;  %v4982_v34 = vpack.c.bf16 %v3587_v23, %v3583_v9  ;;  %v5058_v35 = vpack.c.bf16 %v3588_v22, %v3584_v8 }
 0x229   :  { %v3590_v36 = vmax.f32 %v3446_v26, 0.0  ;;  %v3449_v38 = vadd.f32 %v6424_v57, %v2799_v33  ;;  %v5056_v39 = vpack.c.bf16 %v3589_v25, %v3585_v12 }
 0x22a   :  { %v3592_v40 = vmax.f32 %v3448_v31, 0.0  ;;  %v3591_v19 = vmax.f32 %v3447_v32, 0.0  ;;  %v2522_v41 = vpop.f32.mrb[22].mxu0  ;;  %4983 = vmatprep.subr.bf16.mxu0 %v4982_v34 }
 0x22b   :  { %v3593_v42 = vmax.f32 %v3449_v38, 0.0  ;;  %v3450_v43 = vadd.f32 %v6418_v49, %v2522_v41  ;;  %v2803_v44 = vpop.f32.mrb[22].mxu1  ;;  %v2524_v45 = vpop.f32.mrb[23].mxu0  ;;  %5057 = vmatprep.subr.bf16.mxu1 %v5056_v39  ;;  %4985 = vmatpush1.bf16.msra.mxu0 %v4984_v30 }
 0x22c   :  { %v3452_v46 = vadd.f32 %v6420_v54, %v2803_v44  ;;  %v3451_v47 = vadd.f32 %v6422_v55, %v2524_v45  ;;  %v2805_v48 = vpop.f32.mrb[23].mxu1  ;;  %5059 = vmatpush1.bf16.msra.mxu1 %v5058_v35 }
 0x22d   :  { %v3594_v50 = vmax.f32 %v3450_v43, 0.0  ;;  %v3453_v51 = vadd.f32 %v6424_v57, %v2805_v48 }
 0x22e   :  { %v3596_v52 = vmax.f32 %v3452_v46, 0.0  ;;  %v3595_v53 = vmax.f32 %v3451_v47, 0.0  ;;  %v2528_v56 = vpop.f32.mrb[24].mxu0 }
 0x22f   :  { %v3597_v58 = vmax.f32 %v3453_v51, 0.0  ;;  %v3454_v59 = vadd.f32 %v6418_v49, %v2528_v56  ;;  %v2809_v60 = vpop.f32.mrb[24].mxu1  ;;  %v2530_v61 = vpop.f32.mrb[25].mxu0  ;;  %v4988_v62 = vpack.c.bf16 %v3594_v50, %v3590_v36 }
 0x230   :  { %v3456_v63 = vadd.f32 %v6420_v54, %v2809_v60  ;;  %v3455_v0 = vadd.f32 %v6422_v55, %v2530_v61  ;;  %v2811_v1 = vpop.f32.mrb[25].mxu1  ;;  %v4986_v2 = vpack.c.bf16 %v3595_v53, %v3591_v19  ;;  %v5062_v4 = vpack.c.bf16 %v3596_v52, %v3592_v40 }
 0x231   :  { %v3598_v5 = vmax.f32 %v3454_v59, 0.0  ;;  %v3457_v6 = vadd.f32 %v6424_v57, %v2811_v1  ;;  %v5060_v7 = vpack.c.bf16 %v3597_v58, %v3593_v42 }
 0x232   :  { %v3600_v8 = vmax.f32 %v3456_v63, 0.0  ;;  %v3599_v9 = vmax.f32 %v3455_v0, 0.0  ;;  %v2534_v10 = vpop.f32.mrb[26].mxu0  ;;  %4987 = vmatprep.subr.bf16.mxu0 %v4986_v2 }
 0x233   :  { %v3601_v11 = vmax.f32 %v3457_v6, 0.0  ;;  %v3458_v12 = vadd.f32 %v6418_v49, %v2534_v10  ;;  %v2815_v13 = vpop.f32.mrb[26].mxu1  ;;  %v2536_v14 = vpop.f32.mrb[27].mxu0  ;;  %5061 = vmatprep.subr.bf16.mxu1 %v5060_v7  ;;  %4989 = vmatpush1.bf16.msra.mxu0 %v4988_v62 }
 0x234   :  { %v3460_v15 = vadd.f32 %v6420_v54, %v2815_v13  ;;  %v3459_v16 = vadd.f32 %v6422_v55, %v2536_v14  ;;  %v2817_v17 = vpop.f32.mrb[27].mxu1  ;;  %5063 = vmatpush1.bf16.msra.mxu1 %v5062_v4 }
 0x235   :  { %v3602_v18 = vmax.f32 %v3458_v12, 0.0  ;;  %v3461_v20 = vadd.f32 %v6424_v57, %v2817_v17 }
 0x236   :  { %v3604_v21 = vmax.f32 %v3460_v15, 0.0  ;;  %v3603_v22 = vmax.f32 %v3459_v16, 0.0  ;;  %v2540_v23 = vpop.f32.mrb[28].mxu0 }
 0x237   :  { %v3605_v24 = vmax.f32 %v3461_v20, 0.0  ;;  %v3462_v25 = vadd.f32 %v6418_v49, %v2540_v23  ;;  %v2821_v26 = vpop.f32.mrb[28].mxu1  ;;  %v2542_v27 = vpop.f32.mrb[29].mxu0  ;;  %v4992_v29 = vpack.c.bf16 %v3602_v18, %v3598_v5 }
 0x238   :  { %v3464_v30 = vadd.f32 %v6420_v54, %v2821_v26  ;;  %v3463_v31 = vadd.f32 %v6422_v55, %v2542_v27  ;;  %v2823_v32 = vpop.f32.mrb[29].mxu1  ;;  %v4990_v33 = vpack.c.bf16 %v3603_v22, %v3599_v9  ;;  %v5066_v34 = vpack.c.bf16 %v3604_v21, %v3600_v8 }
 0x239   :  { %v3606_v35 = vmax.f32 %v3462_v25, 0.0  ;;  %v3465_v36 = vadd.f32 %v6424_v57, %v2823_v32  ;;  %v5064_v38 = vpack.c.bf16 %v3605_v24, %v3601_v11 }
 0x23a   :  { %v3608_v39 = vmax.f32 %v3464_v30, 0.0  ;;  %v3607_v40 = vmax.f32 %v3463_v31, 0.0  ;;  %v2546_v19 = vpop.f32.mrb[30].mxu0  ;;  %4991 = vmatprep.subr.bf16.mxu0 %v4990_v33 }
 0x23b   :  { %v3609_v41 = vmax.f32 %v3465_v36, 0.0  ;;  %v3466_v42 = vadd.f32 %v6418_v49, %v2546_v19  ;;  %v2827_v43 = vpop.f32.mrb[30].mxu1  ;;  %v2548_v44 = vpop.f32.mrb[31].mxu0  ;;  %5065 = vmatprep.subr.bf16.mxu1 %v5064_v38  ;;  %4993 = vmatpush1.bf16.msra.mxu0 %v4992_v29 }
 0x23c   :  { %v3468_v45 = vadd.f32 %v6420_v54, %v2827_v43  ;;  %v3467_v46 = vadd.f32 %v6422_v55, %v2548_v44  ;;  %v2829_v47 = vpop.f32.mrb[31].mxu1  ;;  %5067 = vmatpush1.bf16.msra.mxu1 %v5066_v34 }
 0x23d   :  { %v3610_v48 = vmax.f32 %v3466_v42, 0.0  ;;  %v3469_v50 = vadd.f32 %v6424_v57, %v2829_v47 }
 0x23e   :  { %v3612_v51 = vmax.f32 %v3468_v45, 0.0  ;;  %v3611_v52 = vmax.f32 %v3467_v46, 0.0  ;;  %v2552_v53 = vpop.f32.mrb[32].mxu0 }
 0x23f   :  { %v3613_v56 = vmax.f32 %v3469_v50, 0.0  ;;  %v3470_v58 = vadd.f32 %v6418_v49, %v2552_v53  ;;  %v2833_v59 = vpop.f32.mrb[32].mxu1  ;;  %v2554_v60 = vpop.f32.mrb[33].mxu0  ;;  %v4996_v61 = vpack.c.bf16 %v3610_v48, %v3606_v35 }
 0x240   :  { %v3472_v62 = vadd.f32 %v6420_v54, %v2833_v59  ;;  %v3471_v63 = vadd.f32 %v6422_v55, %v2554_v60  ;;  %v2835_v0 = vpop.f32.mrb[33].mxu1  ;;  %v4994_v1 = vpack.c.bf16 %v3611_v52, %v3607_v40  ;;  %v5070_v2 = vpack.c.bf16 %v3612_v51, %v3608_v39 }
 0x241   :  { %v3614_v4 = vmax.f32 %v3470_v58, 0.0  ;;  %v3473_v5 = vadd.f32 %v6424_v57, %v2835_v0  ;;  %v5068_v6 = vpack.c.bf16 %v3613_v56, %v3609_v41 }
 0x242   :  { %v3616_v7 = vmax.f32 %v3472_v62, 0.0  ;;  %v3615_v8 = vmax.f32 %v3471_v63, 0.0  ;;  %v2558_v9 = vpop.f32.mrb[34].mxu0  ;;  %4995 = vmatprep.subr.bf16.mxu0 %v4994_v1 }
 0x243   :  { %v3617_v10 = vmax.f32 %v3473_v5, 0.0  ;;  %v3474_v11 = vadd.f32 %v6418_v49, %v2558_v9  ;;  %v2839_v12 = vpop.f32.mrb[34].mxu1  ;;  %v2560_v13 = vpop.f32.mrb[35].mxu0  ;;  %5069 = vmatprep.subr.bf16.mxu1 %v5068_v6  ;;  %4997 = vmatpush1.bf16.msra.mxu0 %v4996_v61 }
 0x244   :  { %v3476_v14 = vadd.f32 %v6420_v54, %v2839_v12  ;;  %v3475_v15 = vadd.f32 %v6422_v55, %v2560_v13  ;;  %v2841_v16 = vpop.f32.mrb[35].mxu1  ;;  %5071 = vmatpush1.bf16.msra.mxu1 %v5070_v2 }
 0x245   :  { %v3618_v17 = vmax.f32 %v3474_v11, 0.0  ;;  %v3477_v18 = vadd.f32 %v6424_v57, %v2841_v16 }
 0x246   :  { %v3620_v20 = vmax.f32 %v3476_v14, 0.0  ;;  %v3619_v21 = vmax.f32 %v3475_v15, 0.0  ;;  %v2564_v22 = vpop.f32.mrb[36].mxu0 }
 0x247   :  { %v3621_v23 = vmax.f32 %v3477_v18, 0.0  ;;  %v3478_v24 = vadd.f32 %v6418_v49, %v2564_v22  ;;  %v2845_v25 = vpop.f32.mrb[36].mxu1  ;;  %v2566_v26 = vpop.f32.mrb[37].mxu0  ;;  %v5000_v27 = vpack.c.bf16 %v3618_v17, %v3614_v4 }
 0x248   :  { %v3480_v29 = vadd.f32 %v6420_v54, %v2845_v25  ;;  %v3479_v30 = vadd.f32 %v6422_v55, %v2566_v26  ;;  %v2847_v31 = vpop.f32.mrb[37].mxu1  ;;  %v4998_v32 = vpack.c.bf16 %v3619_v21, %v3615_v8  ;;  %v5074_v33 = vpack.c.bf16 %v3620_v20, %v3616_v7 }
 0x249   :  { %v3622_v34 = vmax.f32 %v3478_v24, 0.0  ;;  %v3481_v35 = vadd.f32 %v6424_v57, %v2847_v31  ;;  %v5072_v36 = vpack.c.bf16 %v3621_v23, %v3617_v10 }
 0x24a   :  { %v3624_v38 = vmax.f32 %v3480_v29, 0.0  ;;  %v3623_v39 = vmax.f32 %v3479_v30, 0.0  ;;  %v2570_v40 = vpop.f32.mrb[38].mxu0  ;;  %4999 = vmatprep.subr.bf16.mxu0 %v4998_v32 }
 0x24b   :  { %v3625_v19 = vmax.f32 %v3481_v35, 0.0  ;;  %v3482_v41 = vadd.f32 %v6418_v49, %v2570_v40  ;;  %v2851_v42 = vpop.f32.mrb[38].mxu1  ;;  %v2572_v43 = vpop.f32.mrb[39].mxu0  ;;  %5073 = vmatprep.subr.bf16.mxu1 %v5072_v36  ;;  %5001 = vmatpush1.bf16.msra.mxu0 %v5000_v27 }
 0x24c   :  { %v3484_v44 = vadd.f32 %v6420_v54, %v2851_v42  ;;  %v3483_v45 = vadd.f32 %v6422_v55, %v2572_v43  ;;  %v2853_v46 = vpop.f32.mrb[39].mxu1  ;;  %5075 = vmatpush1.bf16.msra.mxu1 %v5074_v33 }
 0x24d   :  { %v3626_v47 = vmax.f32 %v3482_v41, 0.0  ;;  %v3485_v48 = vadd.f32 %v6424_v57, %v2853_v46 }
 0x24e   :  { %v3628_v50 = vmax.f32 %v3484_v44, 0.0  ;;  %v3627_v51 = vmax.f32 %v3483_v45, 0.0  ;;  %v2576_v52 = vpop.f32.mrb[40].mxu0 }
 0x24f   :  { %v3629_v53 = vmax.f32 %v3485_v48, 0.0  ;;  %v3486_v56 = vadd.f32 %v6418_v49, %v2576_v52  ;;  %v2857_v58 = vpop.f32.mrb[40].mxu1  ;;  %v2578_v59 = vpop.f32.mrb[41].mxu0  ;;  %v5004_v60 = vpack.c.bf16 %v3626_v47, %v3622_v34 }
 0x250   :  { %v3488_v61 = vadd.f32 %v6420_v54, %v2857_v58  ;;  %v3487_v62 = vadd.f32 %v6422_v55, %v2578_v59  ;;  %v2859_v63 = vpop.f32.mrb[41].mxu1  ;;  %v5002_v0 = vpack.c.bf16 %v3627_v51, %v3623_v39  ;;  %v5078_v1 = vpack.c.bf16 %v3628_v50, %v3624_v38 }
 0x251   :  { %v3630_v2 = vmax.f32 %v3486_v56, 0.0  ;;  %v3489_v4 = vadd.f32 %v6424_v57, %v2859_v63  ;;  %v5076_v5 = vpack.c.bf16 %v3629_v53, %v3625_v19 }
 0x252   :  { %v3632_v6 = vmax.f32 %v3488_v61, 0.0  ;;  %v3631_v7 = vmax.f32 %v3487_v62, 0.0  ;;  %v2582_v8 = vpop.f32.mrb[42].mxu0  ;;  %5003 = vmatprep.subr.bf16.mxu0 %v5002_v0 }
 0x253   :  { %v3633_v9 = vmax.f32 %v3489_v4, 0.0  ;;  %v3490_v10 = vadd.f32 %v6418_v49, %v2582_v8  ;;  %v2863_v11 = vpop.f32.mrb[42].mxu1  ;;  %v2584_v12 = vpop.f32.mrb[43].mxu0  ;;  %5077 = vmatprep.subr.bf16.mxu1 %v5076_v5  ;;  %5005 = vmatpush1.bf16.msra.mxu0 %v5004_v60 }
 0x254   :  { %v3492_v13 = vadd.f32 %v6420_v54, %v2863_v11  ;;  %v3491_v14 = vadd.f32 %v6422_v55, %v2584_v12  ;;  %v2865_v15 = vpop.f32.mrb[43].mxu1  ;;  %5079 = vmatpush1.bf16.msra.mxu1 %v5078_v1 }
 0x255   :  { %v3634_v16 = vmax.f32 %v3490_v10, 0.0  ;;  %v3493_v17 = vadd.f32 %v6424_v57, %v2865_v15 }
 0x256   :  { %v3636_v18 = vmax.f32 %v3492_v13, 0.0  ;;  %v3635_v20 = vmax.f32 %v3491_v14, 0.0  ;;  %v2588_v21 = vpop.f32.mrb[44].mxu0 }
 0x257   :  { %v3637_v22 = vmax.f32 %v3493_v17, 0.0  ;;  %v3494_v23 = vadd.f32 %v6418_v49, %v2588_v21  ;;  %v2869_v24 = vpop.f32.mrb[44].mxu1  ;;  %v2590_v25 = vpop.f32.mrb[45].mxu0  ;;  %v5008_v26 = vpack.c.bf16 %v3634_v16, %v3630_v2 }
 0x258   :  { %v3496_v27 = vadd.f32 %v6420_v54, %v2869_v24  ;;  %v3495_v29 = vadd.f32 %v6422_v55, %v2590_v25  ;;  %v2871_v30 = vpop.f32.mrb[45].mxu1  ;;  %v5006_v31 = vpack.c.bf16 %v3635_v20, %v3631_v7  ;;  %v5082_v32 = vpack.c.bf16 %v3636_v18, %v3632_v6 }
 0x259   :  { %v3638_v33 = vmax.f32 %v3494_v23, 0.0  ;;  %v3497_v34 = vadd.f32 %v6424_v57, %v2871_v30  ;;  %v5080_v35 = vpack.c.bf16 %v3637_v22, %v3633_v9 }
 0x25a   :  { %v3640_v36 = vmax.f32 %v3496_v27, 0.0  ;;  %v3639_v38 = vmax.f32 %v3495_v29, 0.0  ;;  %v2594_v39 = vpop.f32.mrb[46].mxu0  ;;  %5007 = vmatprep.subr.bf16.mxu0 %v5006_v31 }
 0x25b   :  { %v3641_v40 = vmax.f32 %v3497_v34, 0.0  ;;  %v3498_v19 = vadd.f32 %v6418_v49, %v2594_v39  ;;  %v2875_v41 = vpop.f32.mrb[46].mxu1  ;;  %v2596_v42 = vpop.f32.mrb[47].mxu0  ;;  %5081 = vmatprep.subr.bf16.mxu1 %v5080_v35  ;;  %5009 = vmatpush1.bf16.msra.mxu0 %v5008_v26 }
 0x25c   :  { %v3500_v43 = vadd.f32 %v6420_v54, %v2875_v41  ;;  %v3499_v44 = vadd.f32 %v6422_v55, %v2596_v42  ;;  %v2877_v45 = vpop.f32.mrb[47].mxu1  ;;  %5083 = vmatpush1.bf16.msra.mxu1 %v5082_v32 }
 0x25d   :  { %v3642_v46 = vmax.f32 %v3498_v19, 0.0  ;;  %v3501_v47 = vadd.f32 %v6424_v57, %v2877_v45 }
 0x25e   :  { %v3644_v48 = vmax.f32 %v3500_v43, 0.0  ;;  %v3643_v50 = vmax.f32 %v3499_v44, 0.0  ;;  %v2600_v51 = vpop.f32.mrb[48].mxu0 }
 0x25f   :  { %v3645_v52 = vmax.f32 %v3501_v47, 0.0  ;;  %v3502_v53 = vadd.f32 %v6418_v49, %v2600_v51  ;;  %v2881_v56 = vpop.f32.mrb[48].mxu1  ;;  %v2602_v58 = vpop.f32.mrb[49].mxu0  ;;  %v5012_v59 = vpack.c.bf16 %v3642_v46, %v3638_v33 }
 0x260   :  { %v3504_v60 = vadd.f32 %v6420_v54, %v2881_v56  ;;  %v3503_v61 = vadd.f32 %v6422_v55, %v2602_v58  ;;  %v2883_v62 = vpop.f32.mrb[49].mxu1  ;;  %v5010_v63 = vpack.c.bf16 %v3643_v50, %v3639_v38  ;;  %v5086_v0 = vpack.c.bf16 %v3644_v48, %v3640_v36 }
 0x261   :  { %v3646_v1 = vmax.f32 %v3502_v53, 0.0  ;;  %v3505_v2 = vadd.f32 %v6424_v57, %v2883_v62  ;;  %v5084_v4 = vpack.c.bf16 %v3645_v52, %v3641_v40 }
 0x262   :  { %v3648_v5 = vmax.f32 %v3504_v60, 0.0  ;;  %v3647_v6 = vmax.f32 %v3503_v61, 0.0  ;;  %v2606_v7 = vpop.f32.mrb[50].mxu0  ;;  %5011 = vmatprep.subr.bf16.mxu0 %v5010_v63 }
 0x263   :  { %v3649_v8 = vmax.f32 %v3505_v2, 0.0  ;;  %v3506_v9 = vadd.f32 %v6418_v49, %v2606_v7  ;;  %v2887_v10 = vpop.f32.mrb[50].mxu1  ;;  %v2608_v11 = vpop.f32.mrb[51].mxu0  ;;  %5085 = vmatprep.subr.bf16.mxu1 %v5084_v4  ;;  %5013 = vmatpush1.bf16.msra.mxu0 %v5012_v59 }
 0x264   :  { %v3508_v12 = vadd.f32 %v6420_v54, %v2887_v10  ;;  %v3507_v13 = vadd.f32 %v6422_v55, %v2608_v11  ;;  %v2889_v14 = vpop.f32.mrb[51].mxu1  ;;  %5087 = vmatpush1.bf16.msra.mxu1 %v5086_v0 }
 0x265   :  { %v3650_v15 = vmax.f32 %v3506_v9, 0.0  ;;  %v3509_v16 = vadd.f32 %v6424_v57, %v2889_v14 }
 0x266   :  { %v3652_v17 = vmax.f32 %v3508_v12, 0.0  ;;  %v3651_v18 = vmax.f32 %v3507_v13, 0.0  ;;  %v2612_v20 = vpop.f32.mrb[52].mxu0 }
 0x267   :  { %v3653_v21 = vmax.f32 %v3509_v16, 0.0  ;;  %v3510_v22 = vadd.f32 %v6418_v49, %v2612_v20  ;;  %v2893_v23 = vpop.f32.mrb[52].mxu1  ;;  %v2614_v24 = vpop.f32.mrb[53].mxu0  ;;  %v5016_v25 = vpack.c.bf16 %v3650_v15, %v3646_v1 }
 0x268   :  { %v3512_v26 = vadd.f32 %v6420_v54, %v2893_v23  ;;  %v3511_v27 = vadd.f32 %v6422_v55, %v2614_v24  ;;  %v2895_v29 = vpop.f32.mrb[53].mxu1  ;;  %v5014_v30 = vpack.c.bf16 %v3651_v18, %v3647_v6  ;;  %v5090_v31 = vpack.c.bf16 %v3652_v17, %v3648_v5 }
 0x269   :  { %v3654_v32 = vmax.f32 %v3510_v22, 0.0  ;;  %v3513_v33 = vadd.f32 %v6424_v57, %v2895_v29  ;;  %v5088_v34 = vpack.c.bf16 %v3653_v21, %v3649_v8 }
 0x26a   :  { %v3656_v35 = vmax.f32 %v3512_v26, 0.0  ;;  %v3655_v36 = vmax.f32 %v3511_v27, 0.0  ;;  %v2618_v38 = vpop.f32.mrb[54].mxu0  ;;  %5015 = vmatprep.subr.bf16.mxu0 %v5014_v30 }
 0x26b   :  { %v3657_v39 = vmax.f32 %v3513_v33, 0.0  ;;  %v3514_v40 = vadd.f32 %v6418_v49, %v2618_v38  ;;  %v2899_v19 = vpop.f32.mrb[54].mxu1  ;;  %v2620_v41 = vpop.f32.mrb[55].mxu0  ;;  %5089 = vmatprep.subr.bf16.mxu1 %v5088_v34  ;;  %5017 = vmatpush1.bf16.msra.mxu0 %v5016_v25 }
 0x26c   :  { %v3516_v42 = vadd.f32 %v6420_v54, %v2899_v19  ;;  %v3515_v43 = vadd.f32 %v6422_v55, %v2620_v41  ;;  %v2901_v44 = vpop.f32.mrb[55].mxu1  ;;  %5091 = vmatpush1.bf16.msra.mxu1 %v5090_v31 }
 0x26d   :  { %v3658_v45 = vmax.f32 %v3514_v40, 0.0  ;;  %v3517_v46 = vadd.f32 %v6424_v57, %v2901_v44 }
 0x26e   :  { %v3660_v47 = vmax.f32 %v3516_v42, 0.0  ;;  %v3659_v48 = vmax.f32 %v3515_v43, 0.0  ;;  %v2624_v50 = vpop.f32.mrb[56].mxu0 }
 0x26f   :  { %v3661_v51 = vmax.f32 %v3517_v46, 0.0  ;;  %v3518_v52 = vadd.f32 %v6418_v49, %v2624_v50  ;;  %v2905_v53 = vpop.f32.mrb[56].mxu1  ;;  %v2626_v56 = vpop.f32.mrb[57].mxu0  ;;  %v5020_v58 = vpack.c.bf16 %v3658_v45, %v3654_v32 }
 0x270   :  { %v3520_v59 = vadd.f32 %v6420_v54, %v2905_v53  ;;  %v3519_v60 = vadd.f32 %v6422_v55, %v2626_v56  ;;  %v2907_v61 = vpop.f32.mrb[57].mxu1  ;;  %v5018_v62 = vpack.c.bf16 %v3659_v48, %v3655_v36  ;;  %v5094_v63 = vpack.c.bf16 %v3660_v47, %v3656_v35 }
 0x271   :  { %v3662_v0 = vmax.f32 %v3518_v52, 0.0  ;;  %v3521_v1 = vadd.f32 %v6424_v57, %v2907_v61  ;;  %v5092_v2 = vpack.c.bf16 %v3661_v51, %v3657_v39 }
 0x272   :  { %v3664_v4 = vmax.f32 %v3520_v59, 0.0  ;;  %v3663_v5 = vmax.f32 %v3519_v60, 0.0  ;;  %v2630_v6 = vpop.f32.mrb[58].mxu0  ;;  %5019 = vmatprep.subr.bf16.mxu0 %v5018_v62 }
 0x273   :  { %v3665_v7 = vmax.f32 %v3521_v1, 0.0  ;;  %v3522_v8 = vadd.f32 %v6418_v49, %v2630_v6  ;;  %v2911_v9 = vpop.f32.mrb[58].mxu1  ;;  %v2632_v10 = vpop.f32.mrb[59].mxu0  ;;  %5093 = vmatprep.subr.bf16.mxu1 %v5092_v2  ;;  %5021 = vmatpush1.bf16.msra.mxu0 %v5020_v58 }
 0x274   :  { %v3524_v11 = vadd.f32 %v6420_v54, %v2911_v9  ;;  %v3523_v12 = vadd.f32 %v6422_v55, %v2632_v10  ;;  %v2913_v13 = vpop.f32.mrb[59].mxu1  ;;  %5095 = vmatpush1.bf16.msra.mxu1 %v5094_v63 }
 0x275   :  { %v3666_v14 = vmax.f32 %v3522_v8, 0.0  ;;  %v3525_v15 = vadd.f32 %v6424_v57, %v2913_v13 }
 0x276   :  { %v3668_v16 = vmax.f32 %v3524_v11, 0.0  ;;  %v3667_v17 = vmax.f32 %v3523_v12, 0.0  ;;  %v2636_v18 = vpop.f32.mrb[60].mxu0 }
 0x277   :  { %v3669_v20 = vmax.f32 %v3525_v15, 0.0  ;;  %v3526_v21 = vadd.f32 %v6418_v49, %v2636_v18  ;;  %v2917_v22 = vpop.f32.mrb[60].mxu1  ;;  %v2638_v23 = vpop.f32.mrb[61].mxu0  ;;  %v5024_v24 = vpack.c.bf16 %v3666_v14, %v3662_v0 }
 0x278   :  { %v3528_v25 = vadd.f32 %v6420_v54, %v2917_v22  ;;  %v3527_v26 = vadd.f32 %v6422_v55, %v2638_v23  ;;  %v2919_v27 = vpop.f32.mrb[61].mxu1  ;;  %v5022_v29 = vpack.c.bf16 %v3667_v17, %v3663_v5  ;;  %v5098_v30 = vpack.c.bf16 %v3668_v16, %v3664_v4 }
 0x279   :  { %v3670_v31 = vmax.f32 %v3526_v21, 0.0  ;;  %v3529_v32 = vadd.f32 %v6424_v57, %v2919_v27  ;;  %v5096_v33 = vpack.c.bf16 %v3669_v20, %v3665_v7 }
 0x27a   :  { %v3672_v34 = vmax.f32 %v3528_v25, 0.0  ;;  %v3671_v35 = vmax.f32 %v3527_v26, 0.0  ;;  %v2642_v36 = vpop.f32.mrb[62].mxu0  ;;  %5023 = vmatprep.subr.bf16.mxu0 %v5022_v29 }
 0x27b   :  { %v3673_v38 = vmax.f32 %v3529_v32, 0.0  ;;  %v3530_v39 = vadd.f32 %v6418_v49, %v2642_v36  ;;  %v2923_v40 = vpop.f32.mrb[62].mxu1  ;;  %v2644_v19 = vpop.f32.mrb[63].mxu0  ;;  %5097 = vmatprep.subr.bf16.mxu1 %v5096_v33  ;;  %5025 = vmatpush1.bf16.msra.mxu0 %v5024_v24  ;;  %v2218_v32 = vld [vmem:[#allocation2 + $0x460] sm:$0x3f] }
 0x27c   :  { %v3532_v41 = vadd.f32 %v6420_v54, %v2923_v40  ;;  %v3531_v42 = vadd.f32 %v6422_v55, %v2644_v19  ;;  %v2925_v43 = vpop.f32.mrb[63].mxu1  ;;  %5099 = vmatpush1.bf16.msra.mxu1 %v5098_v30  ;;  %v2220_v36 = vld [vmem:[#allocation2 + $0x470] sm:$0x3f]  ;;  %v2219_v19 = vld [vmem:[#allocation2 + $0x468] sm:$0x3f] }
 0x27d   :  { %v3674_v44 = vmax.f32 %v3530_v39, 0.0  ;;  %v3533_v45 = vadd.f32 %v6424_v57, %v2925_v43 }
 0x27e   :  { %v3676_v46 = vmax.f32 %v3532_v41, 0.0  ;;  %v3675_v47 = vmax.f32 %v3531_v42, 0.0  ;;  %v2648_v48 = vpop.f32.mrb[64].mxu0 }
 0x27f   :  { %v3677_v50 = vmax.f32 %v3533_v45, 0.0  ;;  %v3534_v51 = vadd.f32 %v6418_v49, %v2648_v48  ;;  %v2929_v52 = vpop.f32.mrb[64].mxu1  ;;  %v2650_v53 = vpop.f32.mrb[65].mxu0  ;;  %v5028_v56 = vpack.c.bf16 %v3674_v44, %v3670_v31  ;;  %v2221_v44 = vld [vmem:[#allocation2 + $0x478] sm:$0x3f] }
 0x280   :  { %v3536_v58 = vadd.f32 %v6420_v54, %v2929_v52  ;;  %v3535_v59 = vadd.f32 %v6422_v55, %v2650_v53  ;;  %v2931_v60 = vpop.f32.mrb[65].mxu1  ;;  %v5026_v61 = vpack.c.bf16 %v3675_v47, %v3671_v35  ;;  %v5102_v62 = vpack.c.bf16 %v3676_v46, %v3672_v34 }
 0x281   :  { %v3678_v63 = vmax.f32 %v3534_v51, 0.0  ;;  %v3537_v0 = vadd.f32 %v6424_v57, %v2931_v60  ;;  %v5100_v1 = vpack.c.bf16 %v3677_v50, %v3673_v38 }
 0x282   :  { %v3680_v2 = vmax.f32 %v3536_v58, 0.0  ;;  %v3679_v4 = vmax.f32 %v3535_v59, 0.0  ;;  %v2654_v5 = vpop.f32.mrb[66].mxu0  ;;  %5027 = vmatprep.subr.bf16.mxu0 %v5026_v61 }
 0x283   :  { %v3681_v6 = vmax.f32 %v3537_v0, 0.0  ;;  %v3538_v7 = vadd.f32 %v6418_v49, %v2654_v5  ;;  %v2935_v8 = vpop.f32.mrb[66].mxu1  ;;  %v2656_v9 = vpop.f32.mrb[67].mxu0  ;;  %5101 = vmatprep.subr.bf16.mxu1 %v5100_v1  ;;  %5029 = vmatpush1.bf16.msra.mxu0 %v5028_v56  ;;  %v4351_v0 = vld [vmem:[%s6837_s6 + $0x188] sm:$0xff] }
 0x284   :  { %v3540_v10 = vadd.f32 %v6420_v54, %v2935_v8  ;;  %v3539_v11 = vadd.f32 %v6422_v55, %v2656_v9  ;;  %v2937_v12 = vpop.f32.mrb[67].mxu1  ;;  %5103 = vmatpush1.bf16.msra.mxu1 %v5102_v62  ;;  %v4303_v8 = vld [vmem:[%s6837_s6 + $0x8] sm:$0xff]  ;;  %v4334_v9 = vld [vmem:[%s6837_s6 + $0x100] sm:$0xff] }
 0x285   :  { %v3682_v13 = vmax.f32 %v3538_v7, 0.0  ;;  %v3541_v14 = vadd.f32 %v6424_v57, %v2937_v12 }
 0x286   :  { %v3684_v15 = vmax.f32 %v3540_v10, 0.0  ;;  %v3683_v16 = vmax.f32 %v3539_v11, 0.0  ;;  %v2660_v17 = vpop.f32.mrb[68].mxu0  ;;  %4083 = vmatmul.mubr.f32.vlgmr.msra.gmra.mrb[76].mxu0 %v6447_v37 }
 0x287   :  { %v3685_v18 = vmax.f32 %v3541_v14, 0.0  ;;  %v6582_v20 = vadd.f32 %v6418_v49, %v2660_v17  ;;  %v2941_v21 = vpop.f32.mrb[68].mxu1  ;;  %v2662_v22 = vpop.f32.mrb[69].mxu0  ;;  %v5032_v23 = vpack.c.bf16 %v3682_v13, %v3678_v63  ;;  %4225 = vmatmul.mubr.f32.vlgmr.msra.gmra.mrb[76].mxu1 %v6447_v37  ;;  %4153 = vmatprep.mubr.f32.mxu0 %v5474_v3  ;;  %v4350_v63 = vld [vmem:[%s6837_s6 + $0x180] sm:$0xff]  ;;  %v4335_v13 = vld [vmem:[%s6837_s6 + $0x108] sm:$0xff]  ;;  %v4320_v14 = vld [vmem:[%s6837_s6 + $0x90] sm:$0xff] }
 0x288   :  { %v6587_v24 = vadd.f32 %v6420_v54, %v2941_v21  ;;  %v3543_v25 = vadd.f32 %v6422_v55, %v2662_v22  ;;  %v2943_v26 = vpop.f32.mrb[69].mxu1  ;;  %v5030_v27 = vpack.c.bf16 %v3683_v16, %v3679_v4  ;;  %v5106_v29 = vpack.c.bf16 %v3684_v15, %v3680_v2  ;;  %4295 = vmatprep.mubr.f32.mxu1 %v5474_v3  ;;  %v4302_v4 = vld [vmem:[%s6837_s6] sm:$0xff]  ;;  %v4321_v15 = vld [vmem:[%s6837_s6 + $0x98] sm:$0xff]  ;;  %v4352_v17 = vld [vmem:[%s6837_s6 + $0x190] sm:$0xff] }
 0x289   :  { %v3686_v30 = vmax.f32 %v6582_v20, 0.0  ;;  %v3545_v31 = vadd.f32 %v6424_v57, %v2943_v26  ;;  %v5104_v33 = vpack.c.bf16 %v3685_v18, %v3681_v6  ;;  %v5146_v12 = vpack.c.bf16 %v4351_v0, %v4350_v63  ;;  %v4353_v18 = vld [vmem:[%s6837_s6 + $0x198] sm:$0xff]  ;;  %v4328_v63 = vld [vmem:[%s6837_s6 + $0xd0] sm:$0xff] }
 0x28a   :  { %v3688_v37 = vmax.f32 %v6587_v24, 0.0  ;;  %v3687_v34 = vmax.f32 %v3543_v25, 0.0  ;;  %v2666_v35 = vpop.f32.mrb[74].mxu0  ;;  %5031 = vmatprep.subr.bf16.mxu0 %v5030_v27  ;;  %v5116_v20 = vpack.c.bf16 %v4303_v8, %v4302_v4  ;;  %v5148_v21 = vpack.c.bf16 %v4335_v13, %v4334_v9  ;;  %v4305_v24 = vld [vmem:[%s6837_s6 + $0x18] sm:$0xff]  ;;  %v4336_v25 = vld [vmem:[%s6837_s6 + $0x110] sm:$0xff]  ;;  %v4331_v13 = vld [vmem:[%s6837_s6 + $0xe8] sm:$0xff] }
 0x28b   :  { %v3689_v38 = vmax.f32 %v3545_v31, 0.0  ;;  %v3092_v39 = vadd.f32 %v2666_v35, %v2218_v32  ;;  %v2947_v40 = vpop.f32.mrb[74].mxu1  ;;  %v2668_v41 = vpop.f32.mrb[75].mxu0  ;;  %5105 = vmatprep.subr.bf16.mxu1 %v5104_v33  ;;  %5033 = vmatpush1.bf16.msra.mxu0 %v5032_v23  ;;  %v5118_v22 = vpack.c.bf16 %v4321_v15, %v4320_v14  ;;  %v4304_v23 = vld [vmem:[%s6837_s6 + $0x10] sm:$0xff]  ;;  %v5150_v26 = vpack.c.bf16 %v4353_v18, %v4352_v17  ;;  %v4337_v27 = vld [vmem:[%s6837_s6 + $0x118] sm:$0xff]  ;;  %v4354_v31 = vld [vmem:[%s6837_s6 + $0x1a0] sm:$0xff] }
 0x28c   :  { %v3094_v42 = vadd.f32 %v2947_v40, %v2220_v36  ;;  %v3093_v43 = vadd.f32 %v2668_v41, %v2219_v19  ;;  %v2949_v45 = vpop.f32.mrb[75].mxu1  ;;  %5107 = vmatpush1.bf16.msra.mxu1 %v5106_v29  ;;  %v4322_v29 = vld [vmem:[%s6837_s6 + $0xa0] sm:$0xff]  ;;  %v4355_v32 = vld [vmem:[%s6837_s6 + $0x1a8] sm:$0xff]  ;;  %v5120_v33 = vpack.c.bf16 %v4305_v24, %v4304_v23  ;;  %v4324_v40 = vld [vmem:[%s6837_s6 + $0xb0] sm:$0xff] }
 0x28d   :  { %3236 = vst [vmem:[#allocation2 + $0x460] sm:$0x3f] %v3092_v39  ;;  %v3095_v46 = vadd.f32 %v2949_v45, %v2221_v44  ;;  %v4306_v35 = vld [vmem:[%s6837_s6 + $0x20] sm:$0xff]  ;;  %v4307_v36 = vld [vmem:[%s6837_s6 + $0x28] sm:$0xff]  ;;  %v4325_v19 = vld [vmem:[%s6837_s6 + $0xb8] sm:$0xff] }
 0x28e   :  { %3238 = vst [vmem:[#allocation2 + $0x470] sm:$0x3f] %v3094_v42  ;;  %3237 = vst [vmem:[#allocation2 + $0x468] sm:$0x3f] %v3093_v43  ;;  %v4339_v39 = vld [vmem:[%s6837_s6 + $0x128] sm:$0xff]  ;;  %v4356_v41 = vld [vmem:[%s6837_s6 + $0x1b0] sm:$0xff]  ;;  %v5124_v43 = vpack.c.bf16 %v4307_v36, %v4306_v35  ;;  %v5126_v45 = vpack.c.bf16 %v4325_v19, %v4324_v40 }
 0x28f   :  { %3239 = vst [vmem:[#allocation2 + $0x478] sm:$0x3f] %v3095_v46  ;;  %v4357_v42 = vld [vmem:[%s6837_s6 + $0x1b8] sm:$0xff]  ;;  %v4308_v46 = vld [vmem:[%s6837_s6 + $0x30] sm:$0xff]  ;;  %v4362_v14 = vld [vmem:[%s6837_s6 + $0x1e0] sm:$0xff] }
 0x290   :  { %v4329_v0 = vld [vmem:[%s6837_s6 + $0xd8] sm:$0xff]  ;;  %v4344_v9 = vld [vmem:[%s6837_s6 + $0x150] sm:$0xff]  ;;  %v4363_v15 = vld [vmem:[%s6837_s6 + $0x1e8] sm:$0xff] }
 0x291   :  { %v4313_v8 = vld [vmem:[%s6837_s6 + $0x58] sm:$0xff]  ;;  %v5170_v23 = vpack.c.bf16 %v4363_v15, %v4362_v14  ;;  %v4347_v24 = vld [vmem:[%s6837_s6 + $0x168] sm:$0xff]  ;;  %v4348_v35 = vld [vmem:[%s6837_s6 + $0x170] sm:$0xff] }
 0x292   :  { %v4506_v40 = vld [vmem:[%s6838_s7] sm:$0xff]  ;;  %v4507_v19 = vld [vmem:[%s6838_s7 + $0x8] sm:$0xff] }
 0x294   :  { %v3380_v47 = vld [vmem:[#allocation2 + $0x460] sm:$0x3f] }
 0x295   :  { %v3546_v48 = vadd.f32 %v6418_v49, %v3380_v47  ;;  %v3382_v50 = vld [vmem:[#allocation2 + $0x470] sm:$0x3f]  ;;  %v3381_v51 = vld [vmem:[#allocation2 + $0x468] sm:$0x3f]  ;;  %v4309_v47 = vld [vmem:[%s6837_s6 + $0x38] sm:$0xff] }
 0x296   :  { %v3548_v52 = vadd.f32 %v6420_v54, %v3382_v50  ;;  %v3547_v53 = vadd.f32 %v6422_v55, %v3381_v51  ;;  %v3383_v56 = vld [vmem:[#allocation2 + $0x478] sm:$0x3f]  ;;  %v4318_v54 = vld [vmem:[%s6837_s6 + $0x80] sm:$0xff]  ;;  %v4319_v55 = vld [vmem:[%s6837_s6 + $0x88] sm:$0xff]  ;;  %v5158_v50 = vpack.c.bf16 %v4357_v42, %v4356_v41  ;;  %v5179_v42 = vpack.c.bf16 %v4507_v19, %v4506_v40 }
 0x297   :  { %v3690_v58 = vmax.f32 %v3546_v48, 0.0  ;;  %v3549_v59 = vadd.f32 %v6424_v57, %v3383_v56  ;;  %v5114_v7 = vpack.c.bf16 %v4319_v55, %v4318_v54  ;;  %v4340_v48 = vld [vmem:[%s6837_s6 + $0x130] sm:$0xff]  ;;  %v4341_v51 = vld [vmem:[%s6837_s6 + $0x138] sm:$0xff]  ;;  %v4358_v56 = vld [vmem:[%s6837_s6 + $0x1c0] sm:$0xff] }
 0x298   :  { %v3692_v60 = vmax.f32 %v3548_v52, 0.0  ;;  %v3691_v61 = vmax.f32 %v3547_v53, 0.0  ;;  %v4326_v52 = vld [vmem:[%s6837_s6 + $0xc0] sm:$0xff]  ;;  %v4327_v53 = vld [vmem:[%s6837_s6 + $0xc8] sm:$0xff] }
 0x299   :  { %3834 = vst [vmem:[#allocation2 + $0x460] sm:$0x3f] %v3690_v58  ;;  %v3693_v62 = vmax.f32 %v3549_v59, 0.0  ;;  %v4359_v58 = vld [vmem:[%s6837_s6 + $0x1c8] sm:$0xff]  ;;  %v5128_v59 = vpack.c.bf16 %v4309_v47, %v4308_v46  ;;  %v4342_v54 = vld [vmem:[%s6837_s6 + $0x140] sm:$0xff]  ;;  %v4508_v46 = vld [vmem:[%s6838_s7 + $0x10] sm:$0xff] }
 0x29a   :  { %3836 = vst [vmem:[#allocation2 + $0x470] sm:$0x3f] %v3692_v60  ;;  %3835 = vst [vmem:[#allocation2 + $0x468] sm:$0x3f] %v3691_v61  ;;  %v5160_v60 = vpack.c.bf16 %v4341_v51, %v4340_v48  ;;  %v5130_v61 = vpack.c.bf16 %v4327_v53, %v4326_v52  ;;  %v4311_v49 = vld [vmem:[%s6837_s6 + $0x48] sm:$0xff]  ;;  %v5162_v55 = vpack.c.bf16 %v4359_v58, %v4358_v56  ;;  %v4509_v47 = vld [vmem:[%s6838_s7 + $0x18] sm:$0xff] }
 0x29b   :  { %3837 = vst [vmem:[#allocation2 + $0x478] sm:$0x3f] %v3693_v62  ;;  %v4310_v62 = vld [vmem:[%s6837_s6 + $0x40] sm:$0xff]  ;;  %v5182_v48 = vpack.c.bf16 %v4509_v47, %v4508_v46 }
 0x29c   :  { %v5132_v4 = vpack.c.bf16 %v4311_v49, %v4310_v62 }
 0x2a0   :  { %v3979_v57 = vld [vmem:[#allocation2 + $0x460] sm:$0x3f] }
 0x2a1   :  { %v3980_v1 = vld [vmem:[#allocation2 + $0x468] sm:$0x3f]  ;;  %v3981_v2 = vld [vmem:[#allocation2 + $0x470] sm:$0x3f]  ;;  %v5037_v11 = vpack.c.bf16 %v3979_v57, %v3686_v30 }
 0x2a2   :  { %v5034_v5 = vpack.c.bf16 %v3980_v1, %v3687_v34  ;;  %v3982_v6 = vld [vmem:[#allocation2 + $0x478] sm:$0x3f]  ;;  %v5111_v16 = vpack.c.bf16 %v3981_v2, %v3688_v37  ;;  %v4323_v30 = vld [vmem:[%s6837_s6 + $0xa8] sm:$0xff]  ;;  %v5152_v37 = vpack.c.bf16 %v4337_v27, %v4336_v25  ;;  %v4360_v1 = vld [vmem:[%s6837_s6 + $0x1d0] sm:$0xff] }
 0x2a3   :  { %v5108_v10 = vpack.c.bf16 %v3982_v6, %v3689_v38  ;;  %v5122_v34 = vpack.c.bf16 %v4323_v30, %v4322_v29  ;;  %v4338_v38 = vld [vmem:[%s6837_s6 + $0x120] sm:$0xff]  ;;  %v4343_v57 = vld [vmem:[%s6837_s6 + $0x148] sm:$0xff]  ;;  %v4361_v2 = vld [vmem:[%s6837_s6 + $0x1d8] sm:$0xff]  ;;  %v5134_v6 = vpack.c.bf16 %v4329_v0, %v4328_v63 }
 0x2a4   :  { %5036 = vmatprep.subr.msk.bf16.mxu0 %vm6598_vm4, %v5034_v5  ;;  %v5156_v44 = vpack.c.bf16 %v4339_v39, %v4338_v38  ;;  %v5164_v5 = vpack.c.bf16 %v4343_v57, %v4342_v54  ;;  %v4332_v25 = vld [vmem:[%s6837_s6 + $0xf0] sm:$0xff]  ;;  %v4365_v29 = vld [vmem:[%s6837_s6 + $0x1f8] sm:$0xff]  ;;  %v5477_v39 = vmov 0.0|0.0   ;;  %v4854_v54 = vld [vmem:[%s6841_s9] ss:$0 sm:$0xff] }
 0x2a5   :  { %5110 = vmatprep.subr.msk.bf16.mxu1 %vm6598_vm4, %v5108_v10  ;;  %5039 = vmatpush1.bf16.msk.msra.mxu0 %vm6598_vm4, %v5037_v11  ;;  %v5166_v10 = vpack.c.bf16 %v4361_v2, %v4360_v1  ;;  %v4345_v11 = vld [vmem:[%s6837_s6 + $0x158] sm:$0xff]  ;;  %v4364_v27 = vld [vmem:[%s6837_s6 + $0x1f0] sm:$0xff] }
 0x2a6   :  { %5113 = vmatpush1.bf16.msk.msra.mxu1 %vm6598_vm4, %v5111_v16  ;;  %5115 = vmatprep.subr.bf16.mxu0 %v5114_v7  ;;  %v4312_v7 = vld [vmem:[%s6837_s6 + $0x50] sm:$0xff]  ;;  %v5168_v17 = vpack.c.bf16 %v4345_v11, %v4344_v9  ;;  %v4349_v38 = vld [vmem:[%s6837_s6 + $0x178] sm:$0xff] }
 0x2a7   :  { %5147 = vmatprep.subr.bf16.mxu1 %v5146_v12  ;;  %v4330_v12 = vld [vmem:[%s6837_s6 + $0xe0] sm:$0xff]  ;;  %v5136_v16 = vpack.c.bf16 %v4313_v8, %v4312_v7 }
 0x2a8   :  { %4848 = vmatmul.mubr.msk.f32.vlgmr.msra.gmra.mrb[76].mxu0 %vm4002_vm5, %v6482_v28  ;;  %v5138_v18 = vpack.c.bf16 %v4331_v13, %v4330_v12 }
 0x2a9   :  { %4851 = vmatmul.mubr.msk.f32.vlgmr.msra.gmra.mrb[76].mxu1 %vm4002_vm5, %v6482_v28  ;;  %5117 = vmatpush3.bf16.msra.mxu0 %v5116_v20  ;;  %v5154_v28 = vpack.c.bf16 %v4355_v32, %v4354_v31  ;;  %v4314_v20 = vld [vmem:[%s6837_s6 + $0x60] sm:$0xff] }
 0x2aa   :  { %5149 = vmatpush3.bf16.msra.mxu1 %v5148_v21  ;;  %5119 = vmatprep.subr.bf16.mxu0 %v5118_v22  ;;  %v4315_v21 = vld [vmem:[%s6837_s6 + $0x68] sm:$0xff]  ;;  %v4346_v22 = vld [vmem:[%s6837_s6 + $0x160] sm:$0xff] }
 0x2ab   :  { %5151 = vmatprep.subr.bf16.mxu1 %v5150_v26  ;;  %v4333_v26 = vld [vmem:[%s6837_s6 + $0xf8] sm:$0xff]  ;;  %v5140_v30 = vpack.c.bf16 %v4315_v21, %v4314_v20  ;;  %v5172_v31 = vpack.c.bf16 %v4347_v24, %v4346_v22 }
 0x2ac   :  { %v5142_v32 = vpack.c.bf16 %v4333_v26, %v4332_v25 }
 0x2ad   :  { %5121 = vmatpush3.bf16.msra.mxu0 %v5120_v33  ;;  %v5174_v33 = vpack.c.bf16 %v4365_v29, %v4364_v27 }
 0x2ae   :  { %5153 = vmatpush3.bf16.msra.mxu1 %v5152_v37  ;;  %5123 = vmatprep.subr.bf16.mxu0 %v5122_v34  ;;  %v4316_v37 = vld [vmem:[%s6837_s6 + $0x70] sm:$0xff]  ;;  %v4317_v34 = vld [vmem:[%s6837_s6 + $0x78] sm:$0xff] }
 0x2af   :  { %5155 = vmatprep.subr.bf16.mxu1 %v5154_v28  ;;  %v5144_v36 = vpack.c.bf16 %v4317_v34, %v4316_v37  ;;  %v5176_v28 = vpack.c.bf16 %v4349_v38, %v4348_v35 }
 0x2b1   :  { %5125 = vmatpush3.bf16.msra.mxu0 %v5124_v43 }
 0x2b2   :  { %5157 = vmatpush3.bf16.msra.mxu1 %v5156_v44  ;;  %5127 = vmatprep.subr.bf16.mxu0 %v5126_v45 }
 0x2b3   :  { %5159 = vmatprep.subr.bf16.mxu1 %v5158_v50 }
 0x2b5   :  { %5129 = vmatpush3.bf16.msra.mxu0 %v5128_v59 }
 0x2b6   :  { %5161 = vmatpush3.bf16.msra.mxu1 %v5160_v60  ;;  %5131 = vmatprep.subr.bf16.mxu0 %v5130_v61  ;;  %v16_v60 = vstv %s6839_s10  ;;  %v4852_v61 = vld [vmem:[%s6840_s8] ss:$0 sm:$0xff] }
 0x2b7   :  { %5163 = vmatprep.subr.bf16.mxu1 %v5162_v55  ;;  %17 = vst [vmem:[#allocation3] sm:$0x1] %v16_v60 }
 0x2b9   :  { %5133 = vmatpush3.bf16.msra.mxu0 %v5132_v4 }
 0x2ba   :  { %5165 = vmatpush3.bf16.msra.mxu1 %v5164_v5  ;;  %5135 = vmatprep.subr.bf16.mxu0 %v5134_v6 }
 0x2bb   :  { %5167 = vmatprep.subr.bf16.mxu1 %v5166_v10 }
 0x2bd   :  { %5137 = vmatpush3.bf16.msra.mxu0 %v5136_v16 }
 0x2be   :  { %5169 = vmatpush3.bf16.msra.mxu1 %v5168_v17  ;;  %5139 = vmatprep.subr.bf16.mxu0 %v5138_v18  ;;  %v4855_v0 = vld [vmem:[#allocation3] ss:$0 sm:$0xff] }
 0x2bf   :  { %5171 = vmatprep.subr.bf16.mxu1 %v5170_v23 }
 0x2c1   :  { %5141 = vmatpush3.bf16.msra.mxu0 %v5140_v30 }
 0x2c2   :  { %5173 = vmatpush3.bf16.msra.mxu1 %v5172_v31  ;;  %5143 = vmatprep.subr.bf16.mxu0 %v5142_v32 }
 0x2c3   :  { %5175 = vmatprep.subr.bf16.mxu1 %v5174_v33 }
 0x2c5   :  { %5145 = vmatpush3.bf16.msra.mxu0 %v5144_v36 }
 0x2c6   :  { %5177 = vmatpush3.bf16.msra.mxu1 %v5176_v28  ;;  %5178 = vmatprep.subr.bf16.mxu0 %v5477_v39 }
 0x37b   :  { %v4155_v41 = vpop.f32.mrb[76].mxu0 }
 0x37c   :  { %v4297_v43 = vpop.f32.mrb[76].mxu1  ;;  %v4157_v44 = vpop.f32.mrb[77].mxu0 }
 0x37d   :  { %v4299_v45 = vpop.f32.mrb[77].mxu1  ;;  %4430 = vmatprep.mubr.f32.mxu0 %v4157_v44 }
 0x37e   :  { %4500 = vmatprep.mubr.f32.mxu1 %v4299_v45  ;;  %4431 = vmatmul.mubr.f32.vlgmr.msra.gmra.mrb[78].mxu0 %v4155_v41 }
 0x37f   :  { %4501 = vmatmul.mubr.f32.vlgmr.msra.gmra.mrb[78].mxu1 %v4297_v43  ;;  %5180 = vmatpush3.bf16.msra.mxu0 %v5179_v42 }
 0x380   :  { %5181 = vmatprep.subr.bf16.mxu0 %v5477_v39  ;;  %4939 = vmatprep.mubr.msk.f32.mxu0 %vm5478_vm6, %v5474_v3 }
 0x383   :  { %5183 = vmatpush3.bf16.msra.mxu0 %v5182_v48 }
 0x451   :  { %v4888_v50 = vpop.f32.mrb[78].mxu0 }
 0x452   :  { %v4923_v51 = vpop.f32.mrb[78].mxu1  ;;  %v4889_v52 = vpop.f32.mrb[79].mxu0 }
 0x453   :  { %v4890_v53 = vadd.f32 %v4889_v52, %v4888_v50  ;;  %v4924_v56 = vpop.f32.mrb[79].mxu1 }
 0x454   :  { %v4925_v58 = vadd.f32 %v4924_v56, %v4923_v51 }
 0x456   :  { %v4503_v59 = vadd.f32 %v4925_v58, %v4890_v53 }
 0x458   :  { %4940 = vmatmul.mubr.msk.f32.vlgmr.msra.gmra.mrb[80].mxu0 %vm4517_vm7, %v4503_v59 }
 0x52b   :  { %v4587_v62 = vpop.f32.mrb[80].mxu0 }
 0x52c   :  { %v4588_v3 = vadd.f32 %v4852_v61, %v4587_v62  ;;  %v4941_v49 = vpop.f32.mrb[81].mxu0 }
 0x52e   :  { %v4591_v55 = vmax.f32 %v4588_v3, 0.0 }
 0x530   :  { %v4599_v57 = vmul.f32 %v4854_v54, %v4591_v55 }
 0x532   :  { %v4601_v63 = vsel %vm4600_vm8, %v4599_v57, 0.0 }
 0x533   :  { %4602 = vadd.xlane.f32.xlu0 %v4601_v63 }
 0x5c0   :  { %v4603_v1 = vpop.xlane.xlu0 %4602 }
 0x5c1   :  { %v4611_v2 = vadd.f32 %v4855_v0, %v4603_v1 }
 0x5c3   :  { %4613 = vst.msk [vmem:[%s6842_s11] sm:$0x3] %vm4612_vm9, %v4611_v2 }

</bundles_post_ra>
